<compile_context>
chip_gen: v6e
topology: v6e:2x2x1
jax: 0.10.0
libtpu: 0.0.40
codegen_flags: <defaults>
</compile_context>

<pallas_src>
import functools
import itertools

import numpy as np
import jax
import jax.numpy as jnp
from jax.experimental import pallas as pl
from jax.experimental.pallas import tpu as pltpu

NEG_INF = -1e30          # logit pad value: softmax/sigmoid of padded classes is exactly 0
MAX_TILE_N = 512         # lane-tile cap; per-step VMEM stays small even for large C


def _round_up(x, m):
    return ((x + m - 1) // m) * m


# Resident target-column table layout (host-built, (T_pad, 21)):
#   0-3  sub box cx,cy,w,h         4-7   obj box cx,cy,w,h
#   8-12 sub box x0,y0,x1,y1,area  13-17 obj box x0,y0,x1,y1,area
#   18   obj-box nonzero mask      19 verb const col_a     20 verb const col_b
_COL_SUB_CXCYWH = 0
_COL_OBJ_CXCYWH = 4
_COL_SUB_XYXYA = 8
_COL_OBJ_XYXYA = 13
_COL_OBJ_MASK = 18
_COL_VERB_A = 19
_COL_VERB_B = 20
_N_TCOLS = 21


# ----------------------------------------------------------------------------
# Pallas kernel: one lane-tile of C^T, everything shaped (T_pad, TILE_N)
# ----------------------------------------------------------------------------
def _matcher_cost_kernel(obj_logits_ref, verb_logits_ref, pred_boxes_ref,
                         b_obj_ref, b_verb_ref, tcol_ref, c_ref, *, w_bbox, w_giou):
    f32 = jnp.float32

    # ---- class costs: two weight-folded MXU matmuls + one rank-1 FMA ----------------
    ol = obj_logits_ref[...]                                   # (C_obj_p, tile)
    m = jnp.max(ol, axis=0, keepdims=True)
    e = jnp.exp(ol - m)                                        # padded classes -> 0
    obj_prob = e * (1.0 / jnp.sum(e, axis=0, keepdims=True))   # exact recip, only (1, tile)

    vp = jax.nn.sigmoid(verb_logits_ref[...])                  # (C_verb_p, tile); padded -> 0
    row_vp = jnp.sum(vp, axis=0, keepdims=True)                # (1, tile)

    cls = (jnp.dot(b_obj_ref[...], obj_prob, preferred_element_type=f32)
           + jnp.dot(b_verb_ref[...], vp, preferred_element_type=f32))   # (T_pad, tile)

    tc = tcol_ref[...]                                         # (T_pad, 21)
    col = lambda k: tc[:, k:k + 1]                             # (T_pad, 1) -> lane broadcast
    cls = cls + (col(_COL_VERB_A) + row_vp * col(_COL_VERB_B))  # leftover rank-1 verb term

    # ---- box L1 costs ----------------------------------------------------------------
    pb = pred_boxes_ref[...]                                   # (8, tile): sub cxcywh, obj cxcywh
    prow = lambda k: pb[k:k + 1, :]                            # (1, tile) -> sublane broadcast

    def pairwise_l1(p0, t0):
        acc = jnp.abs(prow(p0) - col(t0))
        for k in range(1, 4):
            acc = acc + jnp.abs(prow(p0 + k) - col(t0 + k))
        return acc

    obj_mask = col(_COL_OBJ_MASK)                              # 1.0 iff any obj-box coord != 0
    cost_sub_bbox = pairwise_l1(0, _COL_SUB_CXCYWH)
    cost_obj_bbox = pairwise_l1(4, _COL_OBJ_CXCYWH) * obj_mask
    cost_bbox = jnp.maximum(cost_sub_bbox, cost_obj_bbox)

    # ---- GIoU costs (target corners/areas precomputed host-side) ----------------------
    def pred_corners(p0):                                      # cheap (1, tile) row math
        cx, cy, w, h = prow(p0), prow(p0 + 1), prow(p0 + 2), prow(p0 + 3)
        hw, hh = 0.5 * w, 0.5 * h
        x0, x1 = cx - hw, cx + hw
        y0, y1 = cy - hh, cy + hh
        return x0, y0, x1, y1, (x1 - x0) * (y1 - y0)

    def neg_giou(pc, t0):                                      # returns -GIoU, (T_pad, tile)
        ax0, ay0, ax1, ay1, area_a = pc
        bx0, by0 = col(t0), col(t0 + 1)
        bx1, by1 = col(t0 + 2), col(t0 + 3)
        area_b = col(t0 + 4)
        iw = jnp.maximum(jnp.minimum(ax1, bx1) - jnp.maximum(ax0, bx0), 0.0)
        ih = jnp.maximum(jnp.minimum(ay1, by1) - jnp.maximum(ay0, by0), 0.0)
        inter = iw * ih
        union = (area_a + area_b) - inter
        ew = jnp.maximum(jnp.maximum(ax1, bx1) - jnp.minimum(ax0, bx0), 0.0)
        eh = jnp.maximum(jnp.maximum(ay1, by1) - jnp.minimum(ay0, by0), 0.0)
        enc = ew * eh
        # approximate EUP reciprocals on the big slabs; eps-guarded for degenerate boxes
        iou = inter * pl.reciprocal(jnp.maximum(union, 1e-9), approx=True)
        return (enc - union) * pl.reciprocal(jnp.maximum(enc, 1e-9), approx=True) - iou

    cost_sub_giou = neg_giou(pred_corners(0), _COL_SUB_XYXYA)
    cost_obj_giou = neg_giou(pred_corners(4), _COL_OBJ_XYXYA) + cost_sub_giou * (1.0 - obj_mask)
    cost_giou = jnp.maximum(cost_sub_giou, cost_obj_giou)

    c_ref[...] = cls + w_bbox * cost_bbox + w_giou * cost_giou


# ----------------------------------------------------------------------------
# Wrapper: host-side transposition / padding / target preprocessing + pallas_call
# ----------------------------------------------------------------------------
def compute_cost_matrix(obj_logits, verb_logits, sub_bbox, obj_bbox,
                        tgt_obj_labels, tgt_verb_labels, tgt_sub_boxes, tgt_obj_boxes,
                        *, w_obj=1.0, w_verb=1.0, w_bbox=1.0, w_giou=1.0,
                        max_tile=MAX_TILE_N):
    f32 = jnp.float32
    n, c_obj = obj_logits.shape
    c_verb = verb_logits.shape[1]
    t = int(tgt_obj_labels.shape[0])

    c_obj_p = _round_up(max(c_obj, 1), 128)
    c_verb_p = _round_up(max(c_verb, 1), 128)
    t_p = _round_up(max(t, 1), 8)              # targets on the sublane axis -> pad to 8 only

    # lane tiling of the prediction axis: aim for >=4 grid steps, cap the tile width
    n_128 = _round_up(max(n, 1), 128)
    steps = max(1, min(n_128 // 128, 4))
    tile = min(_round_up(-(-n_128 // steps), 128), max_tile)
    n_p = _round_up(n_128, tile)

    # ---- predictions, transposed to (feature, N) and lane-padded ----------------------
    obj_logits_t = jnp.full((c_obj_p, n_p), NEG_INF, f32)
    obj_logits_t = obj_logits_t.at[:c_obj, :n].set(obj_logits.astype(f32).T)
    verb_logits_t = jnp.full((c_verb_p, n_p), NEG_INF, f32)
    verb_logits_t = verb_logits_t.at[:c_verb, :n].set(verb_logits.astype(f32).T)
    pred_boxes_t = jnp.zeros((8, n_p), f32)
    pred_boxes_t = pred_boxes_t.at[0:4, :n].set(sub_bbox.astype(f32).T)
    pred_boxes_t = pred_boxes_t.at[4:8, :n].set(obj_bbox.astype(f32).T)

    # ---- target-side preprocessing (all hoisted out of the kernel) --------------------
    labels = jnp.full((t_p,), -1, jnp.int32).at[:t].set(tgt_obj_labels.astype(jnp.int32))
    onehot = (labels[:, None] ==
              jax.lax.broadcasted_iota(jnp.int32, (t_p, c_obj_p), 1)).astype(f32)
    b_obj = (-float(w_obj)) * onehot                                      # (t_p, c_obj_p)

    tvp = jnp.zeros((t_p, c_verb_p), f32).at[:t, :c_verb].set(tgt_verb_labels.astype(f32))
    s1 = jnp.sum(tvp, axis=1)                                             # positives / target
    s0 = float(c_verb) - s1                                               # negatives / target
    inv_s1 = 1.0 / (s1 + 1e-4)
    inv_s0 = 1.0 / (s0 + 1e-4)
    b_verb = (-0.5 * float(w_verb)) * (inv_s1 + inv_s0)[:, None] * tvp    # (t_p, c_verb_p)
    verb_col_a = (-0.5 * float(w_verb)) * s0 * inv_s0                     # (t_p,)
    verb_col_b = (0.5 * float(w_verb)) * inv_s0

    obj_any = jnp.zeros((t_p,), f32).at[:t].set(
        jnp.any(tgt_obj_boxes != 0, axis=1).astype(f32))

    def box_table(b):
        # padded dummy targets get a non-degenerate box so GIoU stays finite
        bp = jnp.broadcast_to(jnp.array([0.5, 0.5, 1.0, 1.0], f32), (t_p, 4))
        bp = bp.at[:t, :].set(b.astype(f32))
        cx, cy, w, h = bp[:, 0], bp[:, 1], bp[:, 2], bp[:, 3]
        x0, x1 = cx - 0.5 * w, cx + 0.5 * w
        y0, y1 = cy - 0.5 * h, cy + 0.5 * h
        return bp, (x0, y0, x1, y1, (x1 - x0) * (y1 - y0))

    sub_bp, (sx0, sy0, sx1, sy1, sa) = box_table(tgt_sub_boxes)
    obj_bp, (ox0, oy0, ox1, oy1, oa) = box_table(tgt_obj_boxes)
    tcol = jnp.concatenate(
        [sub_bp, obj_bp,
         jnp.stack([sx0, sy0, sx1, sy1, sa, ox0, oy0, ox1, oy1, oa,
                    obj_any, verb_col_a, verb_col_b], axis=1)], axis=1)    # (t_p, 21)

    kernel = functools.partial(_matcher_cost_kernel,
                               w_bbox=float(w_bbox), w_giou=float(w_giou))

    c_t = pl.pallas_call(
        kernel,
        out_shape=jax.ShapeDtypeStruct((t_p, n_p), f32),
        grid=(n_p // tile,),
        in_specs=[
            pl.BlockSpec((c_obj_p, tile), lambda i: (0, i)),     # obj logits^T (lane-tiled)
            pl.BlockSpec((c_verb_p, tile), lambda i: (0, i)),    # verb logits^T
            pl.BlockSpec((8, tile), lambda i: (0, i)),           # pred sub+obj boxes^T
            pl.BlockSpec((t_p, c_obj_p), lambda i: (0, 0)),      # B_obj (resident)
            pl.BlockSpec((t_p, c_verb_p), lambda i: (0, 0)),     # B_verb (resident)
            pl.BlockSpec((t_p, _N_TCOLS), lambda i: (0, 0)),     # target geometry table
        ],
        out_specs=pl.BlockSpec((t_p, tile), lambda i: (0, i)),
        compiler_params=pltpu.CompilerParams(
            dimension_semantics=("parallel",)),                  # megacore split of lane tiles
    )(obj_logits_t, verb_logits_t, pred_boxes_t, b_obj, b_verb, tcol)

    return c_t[:t, :n].T                                         # (N, T) like the torch code


# ----------------------------------------------------------------------------
# Host glue: target concatenation + Hungarian assignment
# ----------------------------------------------------------------------------
# TODO(synk): linear_sum_assignment (Hungarian) is sequential/combinatorial — done on host
# (brute-force permutation search; fine only for the small T used in this test).
def _linear_sum_assignment(cost):
    nq, nt = cost.shape
    if nt == 0:
        return np.zeros((0,), np.int64), np.zeros((0,), np.int64)
    best_rows, best_cost = None, np.inf
    for rows in itertools.permutations(range(nq), nt):
        c = sum(cost[r, j] for j, r in enumerate(rows))
        if c < best_cost:
            best_cost, best_rows = c, rows
    rows = np.asarray(best_rows, np.int64)
    cols = np.arange(nt, dtype=np.int64)
    order = np.argsort(rows)
    return rows[order], cols[order]


def hungarian_matcher_hoi(outputs, targets, *, cost_obj_class=1.0, cost_verb_class=1.0,
                          cost_bbox=1.0, cost_giou=1.0):
    bs, num_queries = outputs['pred_obj_logits'].shape[:2]

    obj_logits = outputs['pred_obj_logits'].reshape(bs * num_queries, -1)
    verb_logits = outputs['pred_verb_logits'].reshape(bs * num_queries, -1)
    sub_bbox = outputs['pred_sub_boxes'].reshape(bs * num_queries, 4)
    obj_bbox = outputs['pred_obj_boxes'].reshape(bs * num_queries, 4)

    tgt_obj_labels = jnp.concatenate([v['obj_labels'] for v in targets]).astype(jnp.int32)
    tgt_verb_labels = jnp.concatenate([v['verb_labels'] for v in targets]).astype(jnp.float32)
    tgt_sub_boxes = jnp.concatenate([v['sub_boxes'] for v in targets]).astype(jnp.float32)
    tgt_obj_boxes = jnp.concatenate([v['obj_boxes'] for v in targets]).astype(jnp.float32)

    C = compute_cost_matrix(obj_logits, verb_logits, sub_bbox, obj_bbox,
                            tgt_obj_labels, tgt_verb_labels, tgt_sub_boxes, tgt_obj_boxes,
                            w_obj=cost_obj_class, w_verb=cost_verb_class,
                            w_bbox=cost_bbox, w_giou=cost_giou)
    C = jax.block_until_ready(C)
    C_np = np.asarray(C).reshape(bs, num_queries, -1)

    sizes = [int(v['obj_labels'].shape[0]) for v in targets]
    indices, start = [], 0
    for i, s in enumerate(sizes):
        indices.append(_linear_sum_assignment(C_np[i][:, start:start + s]))
        start += s
    return indices, C


# ----------------------------------------------------------------------------
# Pure-numpy reference of the cost matrix (for correctness check)
# ----------------------------------------------------------------------------
def _ref_cost_matrix(obj_logits, verb_logits, sub_bbox, obj_bbox,
                     labels, tv, tsb, tob, w_obj, w_verb, w_bbox, w_giou):
    def softmax(x):
        e = np.exp(x - x.max(-1, keepdims=True))
        return e / e.sum(-1, keepdims=True)

    def sigmoid(x):
        return 1.0 / (1.0 + np.exp(-x))

    def cxcywh_to_xyxy(b):
        cx, cy, w, h = b[:, 0], b[:, 1], b[:, 2], b[:, 3]
        return np.stack([cx - 0.5 * w, cy - 0.5 * h, cx + 0.5 * w, cy + 0.5 * h], -1)

    def giou(a, b):
        a, b = cxcywh_to_xyxy(a), cxcywh_to_xyxy(b)
        area_a = (a[:, 2] - a[:, 0]) * (a[:, 3] - a[:, 1])
        area_b = (b[:, 2] - b[:, 0]) * (b[:, 3] - b[:, 1])
        lt = np.maximum(a[:, None, :2], b[None, :, :2])
        rb = np.minimum(a[:, None, 2:], b[None, :, 2:])
        wh = np.clip(rb - lt, 0, None)
        inter = wh[..., 0] * wh[..., 1]
        union = area_a[:, None] + area_b[None, :] - inter
        iou = inter / union
        lt2 = np.minimum(a[:, None, :2], b[None, :, :2])
        rb2 = np.maximum(a[:, None, 2:], b[None, :, 2:])
        wh2 = np.clip(rb2 - lt2, 0, None)
        enc = wh2[..., 0] * wh2[..., 1]
        return iou - (enc - union) / enc

    op = softmax(obj_logits)
    c_obj = -op[:, labels]
    vp = sigmoid(verb_logits)
    tvp = tv.T
    c_verb = -(vp @ tvp / (tvp.sum(0, keepdims=True) + 1e-4)
               + (1 - vp) @ (1 - tvp) / ((1 - tvp).sum(0, keepdims=True) + 1e-4)) / 2
    c_sb = np.abs(sub_bbox[:, None, :] - tsb[None, :, :]).sum(-1)
    c_ob = np.abs(obj_bbox[:, None, :] - tob[None, :, :]).sum(-1) * (tob != 0).any(1)[None, :]
    c_bbox = np.maximum(c_sb, c_ob)
    c_sg = -giou(sub_bbox, tsb)
    c_og = -giou(obj_bbox, tob) + c_sg * (tob == 0).all(1)[None, :]
    c_giou = np.maximum(c_sg, c_og)
    return w_obj * c_obj + w_verb * c_verb + w_bbox * c_bbox + w_giou * c_giou


# ----------------------------------------------------------------------------
if __name__ == "__main__":
    key = jax.random.PRNGKey(0)
    bs, num_queries = 2, 8
    num_obj_classes, num_verb_classes = 12, 8
    sizes = [3, 2]

    ks = jax.random.split(key, 12)
    outputs = {
        'pred_obj_logits': jax.random.normal(ks[0], (bs, num_queries, num_obj_classes), jnp.float32),
        'pred_verb_logits': jax.random.normal(ks[1], (bs, num_queries, num_verb_classes), jnp.float32),
        'pred_sub_boxes': jnp.concatenate([
            jax.random.uniform(ks[2], (bs, num_queries, 2), minval=0.2, maxval=0.8),
            jax.random.uniform(ks[3], (bs, num_queries, 2), minval=0.1, maxval=0.3)], -1).astype(jnp.float32),
        'pred_obj_boxes': jnp.concatenate([
            jax.random.uniform(ks[4], (bs, num_queries, 2), minval=0.2, maxval=0.8),
            jax.random.uniform(ks[5], (bs, num_queries, 2), minval=0.1, maxval=0.3)], -1).astype(jnp.float32),
    }

    targets = []
    for i, s in enumerate(sizes):
        kk = jax.random.split(ks[6 + i], 5)
        obj_boxes = jnp.concatenate([
            jax.random.uniform(kk[2], (s, 2), minval=0.2, maxval=0.8),
            jax.random.uniform(kk[3], (s, 2), minval=0.1, maxval=0.3)], -1).astype(jnp.float32)
        if i == 1:  # exercise the zero-object-box masking path
            obj_boxes = obj_boxes.at[0].set(0.0)
        targets.append({
            'obj_labels': jax.random.randint(kk[0], (s,), 0, num_obj_classes, jnp.int32),
            'verb_labels': (jax.random.uniform(kk[1], (s, num_verb_classes)) < 0.3).astype(jnp.float32),
            'sub_boxes': jnp.concatenate([
                jax.random.uniform(kk[4], (s, 2), minval=0.2, maxval=0.8),
                jax.random.uniform(kk[4], (s, 2), minval=0.1, maxval=0.3)], -1).astype(jnp.float32),
            'obj_boxes': obj_boxes,
        })

    # cost weights (module __init__ defaults), deterministic
    w_obj, w_verb, w_bbox, w_giou = 1.0, 1.0, 1.0, 1.0

    indices, C = hungarian_matcher_hoi(outputs, targets,
                                       cost_obj_class=w_obj, cost_verb_class=w_verb,
                                       cost_bbox=w_bbox, cost_giou=w_giou)
    C = jax.block_until_ready(C)

    # correctness check against a pure-numpy reference (approx EUP reciprocals only remain
    # in the GIoU union/enclosure terms; softmax reciprocal is now exact)
    C_ref = _ref_cost_matrix(
        np.asarray(outputs['pred_obj_logits']).reshape(-1, num_obj_classes),
        np.asarray(outputs['pred_verb_logits']).reshape(-1, num_verb_classes),
        np.asarray(outputs['pred_sub_boxes']).reshape(-1, 4),
        np.asarray(outputs['pred_obj_boxes']).reshape(-1, 4),
        np.concatenate([np.asarray(t['obj_labels']) for t in targets]),
        np.concatenate([np.asarray(t['verb_labels']) for t in targets]),
        np.concatenate([np.asarray(t['sub_boxes']) for t in targets]),
        np.concatenate([np.asarray(t['obj_boxes']) for t in targets]),
        w_obj, w_verb, w_bbox, w_giou)
    np.testing.assert_allclose(np.asarray(C), C_ref, rtol=1e-2, atol=1e-2)

    assert len(indices) == bs
    print("KERNEL_OK")
</pallas_src>

<mosaic_0001>
module attributes {stable_mosaic.version = 11 : i64} {
  func.func @_matcher_cost_kernel(%arg0: i32, %arg1: memref<128x128xf32, #tpu.memory_space<vmem>>, %arg2: memref<128x128xf32, #tpu.memory_space<vmem>>, %arg3: memref<8x128xf32, #tpu.memory_space<vmem>>, %arg4: memref<8x128xf32, #tpu.memory_space<vmem>>, %arg5: memref<8x128xf32, #tpu.memory_space<vmem>>, %arg6: memref<8x21xf32, #tpu.memory_space<vmem>>, %arg7: memref<8x128xf32, #tpu.memory_space<vmem>>) attributes {dimension_semantics = [#tpu.dimension_semantics<parallel>], iteration_bounds = array<i64: 1>, scalar_prefetch = 0 : i64, scratch_operands = 0 : i64, tpu.core_type = #tpu.core_type<tc>, window_params = [{transform_indices = @transform_0, window_bounds = array<i64: 128, 128>}, {transform_indices = @transform_1, window_bounds = array<i64: 128, 128>}, {transform_indices = @transform_2, window_bounds = array<i64: 8, 128>}, {pipeline_mode = #tpu.pipeline_mode<synchronous>, transform_indices = @transform_3, window_bounds = array<i64: 8, 128>}, {pipeline_mode = #tpu.pipeline_mode<synchronous>, transform_indices = @transform_4, window_bounds = array<i64: 8, 128>}, {pipeline_mode = #tpu.pipeline_mode<synchronous>, transform_indices = @transform_5, window_bounds = array<i64: 8, 21>}, {transform_indices = @transform_6, window_bounds = array<i64: 8, 128>}]} {
    %c0 = arith.constant 0 : index
    %c0_0 = arith.constant 0 : index
    %0 = vector.load %arg1[%c0, %c0_0] : memref<128x128xf32, #tpu.memory_space<vmem>>, vector<128x128xf32>
    %cst = arith.constant dense<0xFF800000> : vector<128xf32>
    %1 = vector.multi_reduction <maximumf>, %0, %cst [0] : vector<128x128xf32> to vector<128xf32>
    %2 = vector.shape_cast %1 : vector<128xf32> to vector<1x128xf32>
    %3 = vector.broadcast %2 : vector<1x128xf32> to vector<128x128xf32>
    %4 = arith.subf %0, %3 : vector<128x128xf32>
    %5 = math.exp %4 : vector<128x128xf32>
    %cst_1 = arith.constant dense<0.000000e+00> : vector<128xf32>
    %6 = vector.multi_reduction <add>, %5, %cst_1 [0] : vector<128x128xf32> to vector<128xf32>
    %7 = vector.shape_cast %6 : vector<128xf32> to vector<1x128xf32>
    %cst_2 = arith.constant 1.000000e+00 : f32
    %8 = vector.broadcast %cst_2 : f32 to vector<1x128xf32>
    %9 = arith.divf %8, %7 : vector<1x128xf32>
    %10 = vector.broadcast %9 : vector<1x128xf32> to vector<128x128xf32>
    %11 = arith.mulf %5, %10 : vector<128x128xf32>
    %c0_3 = arith.constant 0 : index
    %c0_4 = arith.constant 0 : index
    %12 = vector.load %arg2[%c0_3, %c0_4] : memref<128x128xf32, #tpu.memory_space<vmem>>, vector<128x128xf32>
    %13 = arith.negf %12 : vector<128x128xf32>
    %14 = math.exp %13 : vector<128x128xf32>
    %cst_5 = arith.constant 1.000000e+00 : f32
    %15 = vector.broadcast %cst_5 : f32 to vector<128x128xf32>
    %16 = arith.addf %15, %14 : vector<128x128xf32>
    %17 = arith.divf %15, %16 : vector<128x128xf32>
    %cst_6 = arith.constant dense<0.000000e+00> : vector<128xf32>
    %18 = vector.multi_reduction <add>, %17, %cst_6 [0] : vector<128x128xf32> to vector<128xf32>
    %19 = vector.shape_cast %18 : vector<128xf32> to vector<1x128xf32>
    %c0_7 = arith.constant 0 : index
    %c0_8 = arith.constant 0 : index
    %20 = vector.load %arg4[%c0_7, %c0_8] : memref<8x128xf32, #tpu.memory_space<vmem>>, vector<8x128xf32>
    %cst_9 = arith.constant dense<0.000000e+00> : vector<8x128xf32>
    %21 = tpu.matmul %20, %11, %cst_9 {dimension_numbers = #tpu.dot_dimension_numbers<[1], [0], [0], [1], [0, 0, 1, 1], [], []>} : vector<8x128xf32>, vector<128x128xf32>, vector<8x128xf32> -> vector<8x128xf32>
    %c0_10 = arith.constant 0 : index
    %c0_11 = arith.constant 0 : index
    %22 = vector.load %arg5[%c0_10, %c0_11] : memref<8x128xf32, #tpu.memory_space<vmem>>, vector<8x128xf32>
    %cst_12 = arith.constant dense<0.000000e+00> : vector<8x128xf32>
    %23 = tpu.matmul %22, %17, %cst_12 {dimension_numbers = #tpu.dot_dimension_numbers<[1], [0], [0], [1], [0, 0, 1, 1], [], []>} : vector<8x128xf32>, vector<128x128xf32>, vector<8x128xf32> -> vector<8x128xf32>
    %24 = arith.addf %21, %23 : vector<8x128xf32>
    %c0_13 = arith.constant 0 : index
    %c0_14 = arith.constant 0 : index
    %25 = vector.load %arg6[%c0_13, %c0_14] : memref<8x21xf32, #tpu.memory_space<vmem>>, vector<8x21xf32>
    %26 = vector.extract_strided_slice %25 {offsets = [0, 19], sizes = [8, 1], strides = [1, 1]} : vector<8x21xf32> to vector<8x1xf32>
    %27 = vector.extract_strided_slice %25 {offsets = [0, 20], sizes = [8, 1], strides = [1, 1]} : vector<8x21xf32> to vector<8x1xf32>
    %28 = vector.broadcast %19 : vector<1x128xf32> to vector<8x128xf32>
    %29 = vector.broadcast %27 : vector<8x1xf32> to vector<8x128xf32>
    %30 = arith.mulf %28, %29 : vector<8x128xf32>
    %31 = vector.broadcast %26 : vector<8x1xf32> to vector<8x128xf32>
    %32 = arith.addf %31, %30 : vector<8x128xf32>
    %33 = arith.addf %24, %32 : vector<8x128xf32>
    %c0_15 = arith.constant 0 : index
    %c0_16 = arith.constant 0 : index
    %34 = vector.load %arg3[%c0_15, %c0_16] : memref<8x128xf32, #tpu.memory_space<vmem>>, vector<8x128xf32>
    %35 = vector.extract_strided_slice %25 {offsets = [0, 18], sizes = [8, 1], strides = [1, 1]} : vector<8x21xf32> to vector<8x1xf32>
    %36 = vector.extract_strided_slice %34 {offsets = [0, 0], sizes = [1, 128], strides = [1, 1]} : vector<8x128xf32> to vector<1x128xf32>
    %37 = vector.extract_strided_slice %25 {offsets = [0, 0], sizes = [8, 1], strides = [1, 1]} : vector<8x21xf32> to vector<8x1xf32>
    %38 = vector.broadcast %36 : vector<1x128xf32> to vector<8x128xf32>
    %39 = vector.broadcast %37 : vector<8x1xf32> to vector<8x128xf32>
    %40 = arith.subf %38, %39 : vector<8x128xf32>
    %41 = math.absf %40 : vector<8x128xf32>
    %42 = vector.extract_strided_slice %34 {offsets = [1, 0], sizes = [1, 128], strides = [1, 1]} : vector<8x128xf32> to vector<1x128xf32>
    %43 = vector.extract_strided_slice %25 {offsets = [0, 1], sizes = [8, 1], strides = [1, 1]} : vector<8x21xf32> to vector<8x1xf32>
    %44 = vector.broadcast %42 : vector<1x128xf32> to vector<8x128xf32>
    %45 = vector.broadcast %43 : vector<8x1xf32> to vector<8x128xf32>
    %46 = arith.subf %44, %45 : vector<8x128xf32>
    %47 = math.absf %46 : vector<8x128xf32>
    %48 = arith.addf %41, %47 : vector<8x128xf32>
    %49 = vector.extract_strided_slice %34 {offsets = [2, 0], sizes = [1, 128], strides = [1, 1]} : vector<8x128xf32> to vector<1x128xf32>
    %50 = vector.extract_strided_slice %25 {offsets = [0, 2], sizes = [8, 1], strides = [1, 1]} : vector<8x21xf32> to vector<8x1xf32>
    %51 = vector.broadcast %49 : vector<1x128xf32> to vector<8x128xf32>
    %52 = vector.broadcast %50 : vector<8x1xf32> to vector<8x128xf32>
    %53 = arith.subf %51, %52 : vector<8x128xf32>
    %54 = math.absf %53 : vector<8x128xf32>
    %55 = arith.addf %48, %54 : vector<8x128xf32>
    %56 = vector.extract_strided_slice %34 {offsets = [3, 0], sizes = [1, 128], strides = [1, 1]} : vector<8x128xf32> to vector<1x128xf32>
    %57 = vector.extract_strided_slice %25 {offsets = [0, 3], sizes = [8, 1], strides = [1, 1]} : vector<8x21xf32> to vector<8x1xf32>
    %58 = vector.broadcast %56 : vector<1x128xf32> to vector<8x128xf32>
    %59 = vector.broadcast %57 : vector<8x1xf32> to vector<8x128xf32>
    %60 = arith.subf %58, %59 : vector<8x128xf32>
    %61 = math.absf %60 : vector<8x128xf32>
    %62 = arith.addf %55, %61 : vector<8x128xf32>
    %63 = vector.extract_strided_slice %34 {offsets = [4, 0], sizes = [1, 128], strides = [1, 1]} : vector<8x128xf32> to vector<1x128xf32>
    %64 = vector.extract_strided_slice %25 {offsets = [0, 4], sizes = [8, 1], strides = [1, 1]} : vector<8x21xf32> to vector<8x1xf32>
    %65 = vector.broadcast %63 : vector<1x128xf32> to vector<8x128xf32>
    %66 = vector.broadcast %64 : vector<8x1xf32> to vector<8x128xf32>
    %67 = arith.subf %65, %66 : vector<8x128xf32>
    %68 = math.absf %67 : vector<8x128xf32>
    %69 = vector.extract_strided_slice %34 {offsets = [5, 0], sizes = [1, 128], strides = [1, 1]} : vector<8x128xf32> to vector<1x128xf32>
    %70 = vector.extract_strided_slice %25 {offsets = [0, 5], sizes = [8, 1], strides = [1, 1]} : vector<8x21xf32> to vector<8x1xf32>
    %71 = vector.broadcast %69 : vector<1x128xf32> to vector<8x128xf32>
    %72 = vector.broadcast %70 : vector<8x1xf32> to vector<8x128xf32>
    %73 = arith.subf %71, %72 : vector<8x128xf32>
    %74 = math.absf %73 : vector<8x128xf32>
    %75 = arith.addf %68, %74 : vector<8x128xf32>
    %76 = vector.extract_strided_slice %34 {offsets = [6, 0], sizes = [1, 128], strides = [1, 1]} : vector<8x128xf32> to vector<1x128xf32>
    %77 = vector.extract_strided_slice %25 {offsets = [0, 6], sizes = [8, 1], strides = [1, 1]} : vector<8x21xf32> to vector<8x1xf32>
    %78 = vector.broadcast %76 : vector<1x128xf32> to vector<8x128xf32>
    %79 = vector.broadcast %77 : vector<8x1xf32> to vector<8x128xf32>
    %80 = arith.subf %78, %79 : vector<8x128xf32>
    %81 = math.absf %80 : vector<8x128xf32>
    %82 = arith.addf %75, %81 : vector<8x128xf32>
    %83 = vector.extract_strided_slice %34 {offsets = [7, 0], sizes = [1, 128], strides = [1, 1]} : vector<8x128xf32> to vector<1x128xf32>
    %84 = vector.extract_strided_slice %25 {offsets = [0, 7], sizes = [8, 1], strides = [1, 1]} : vector<8x21xf32> to vector<8x1xf32>
    %85 = vector.broadcast %83 : vector<1x128xf32> to vector<8x128xf32>
    %86 = vector.broadcast %84 : vector<8x1xf32> to vector<8x128xf32>
    %87 = arith.subf %85, %86 : vector<8x128xf32>
    %88 = math.absf %87 : vector<8x128xf32>
    %89 = arith.addf %82, %88 : vector<8x128xf32>
    %90 = vector.broadcast %35 : vector<8x1xf32> to vector<8x128xf32>
    %91 = arith.mulf %89, %90 : vector<8x128xf32>
    %92 = arith.maximumf %62, %91 : vector<8x128xf32>
    %93 = vector.extract_strided_slice %34 {offsets = [0, 0], sizes = [1, 128], strides = [1, 1]} : vector<8x128xf32> to vector<1x128xf32>
    %94 = vector.extract_strided_slice %34 {offsets = [1, 0], sizes = [1, 128], strides = [1, 1]} : vector<8x128xf32> to vector<1x128xf32>
    %95 = vector.extract_strided_slice %34 {offsets = [2, 0], sizes = [1, 128], strides = [1, 1]} : vector<8x128xf32> to vector<1x128xf32>
    %96 = vector.extract_strided_slice %34 {offsets = [3, 0], sizes = [1, 128], strides = [1, 1]} : vector<8x128xf32> to vector<1x128xf32>
    %cst_17 = arith.constant 5.000000e-01 : f32
    %97 = vector.broadcast %cst_17 : f32 to vector<1x128xf32>
    %98 = arith.mulf %97, %95 : vector<1x128xf32>
    %cst_18 = arith.constant 5.000000e-01 : f32
    %99 = vector.broadcast %cst_18 : f32 to vector<1x128xf32>
    %100 = arith.mulf %99, %96 : vector<1x128xf32>
    %101 = arith.subf %93, %98 : vector<1x128xf32>
    %102 = arith.addf %93, %98 : vector<1x128xf32>
    %103 = arith.subf %94, %100 : vector<1x128xf32>
    %104 = arith.addf %94, %100 : vector<1x128xf32>
    %105 = arith.subf %102, %101 : vector<1x128xf32>
    %106 = arith.subf %104, %103 : vector<1x128xf32>
    %107 = arith.mulf %105, %106 : vector<1x128xf32>
    %108 = vector.extract_strided_slice %25 {offsets = [0, 8], sizes = [8, 1], strides = [1, 1]} : vector<8x21xf32> to vector<8x1xf32>
    %109 = vector.extract_strided_slice %25 {offsets = [0, 9], sizes = [8, 1], strides = [1, 1]} : vector<8x21xf32> to vector<8x1xf32>
    %110 = vector.extract_strided_slice %25 {offsets = [0, 10], sizes = [8, 1], strides = [1, 1]} : vector<8x21xf32> to vector<8x1xf32>
    %111 = vector.extract_strided_slice %25 {offsets = [0, 11], sizes = [8, 1], strides = [1, 1]} : vector<8x21xf32> to vector<8x1xf32>
    %112 = vector.extract_strided_slice %25 {offsets = [0, 12], sizes = [8, 1], strides = [1, 1]} : vector<8x21xf32> to vector<8x1xf32>
    %113 = vector.broadcast %102 : vector<1x128xf32> to vector<8x128xf32>
    %114 = vector.broadcast %110 : vector<8x1xf32> to vector<8x128xf32>
    %115 = arith.minimumf %113, %114 : vector<8x128xf32>
    %116 = vector.broadcast %101 : vector<1x128xf32> to vector<8x128xf32>
    %117 = vector.broadcast %108 : vector<8x1xf32> to vector<8x128xf32>
    %118 = arith.maximumf %116, %117 : vector<8x128xf32>
    %119 = arith.subf %115, %118 : vector<8x128xf32>
    %cst_19 = arith.constant 0.000000e+00 : f32
    %120 = vector.broadcast %cst_19 : f32 to vector<8x128xf32>
    %121 = arith.maximumf %119, %120 : vector<8x128xf32>
    %122 = vector.broadcast %104 : vector<1x128xf32> to vector<8x128xf32>
    %123 = vector.broadcast %111 : vector<8x1xf32> to vector<8x128xf32>
    %124 = arith.minimumf %122, %123 : vector<8x128xf32>
    %125 = vector.broadcast %103 : vector<1x128xf32> to vector<8x128xf32>
    %126 = vector.broadcast %109 : vector<8x1xf32> to vector<8x128xf32>
    %127 = arith.maximumf %125, %126 : vector<8x128xf32>
    %128 = arith.subf %124, %127 : vector<8x128xf32>
    %cst_20 = arith.constant 0.000000e+00 : f32
    %129 = vector.broadcast %cst_20 : f32 to vector<8x128xf32>
    %130 = arith.maximumf %128, %129 : vector<8x128xf32>
    %131 = arith.mulf %121, %130 : vector<8x128xf32>
    %132 = vector.broadcast %107 : vector<1x128xf32> to vector<8x128xf32>
    %133 = vector.broadcast %112 : vector<8x1xf32> to vector<8x128xf32>
    %134 = arith.addf %132, %133 : vector<8x128xf32>
    %135 = arith.subf %134, %131 : vector<8x128xf32>
    %136 = vector.broadcast %102 : vector<1x128xf32> to vector<8x128xf32>
    %137 = vector.broadcast %110 : vector<8x1xf32> to vector<8x128xf32>
    %138 = arith.maximumf %136, %137 : vector<8x128xf32>
    %139 = vector.broadcast %101 : vector<1x128xf32> to vector<8x128xf32>
    %140 = vector.broadcast %108 : vector<8x1xf32> to vector<8x128xf32>
    %141 = arith.minimumf %139, %140 : vector<8x128xf32>
    %142 = arith.subf %138, %141 : vector<8x128xf32>
    %cst_21 = arith.constant 0.000000e+00 : f32
    %143 = vector.broadcast %cst_21 : f32 to vector<8x128xf32>
    %144 = arith.maximumf %142, %143 : vector<8x128xf32>
    %145 = vector.broadcast %104 : vector<1x128xf32> to vector<8x128xf32>
    %146 = vector.broadcast %111 : vector<8x1xf32> to vector<8x128xf32>
    %147 = arith.maximumf %145, %146 : vector<8x128xf32>
    %148 = vector.broadcast %103 : vector<1x128xf32> to vector<8x128xf32>
    %149 = vector.broadcast %109 : vector<8x1xf32> to vector<8x128xf32>
    %150 = arith.minimumf %148, %149 : vector<8x128xf32>
    %151 = arith.subf %147, %150 : vector<8x128xf32>
    %cst_22 = arith.constant 0.000000e+00 : f32
    %152 = vector.broadcast %cst_22 : f32 to vector<8x128xf32>
    %153 = arith.maximumf %151, %152 : vector<8x128xf32>
    %154 = arith.mulf %144, %153 : vector<8x128xf32>
    %cst_23 = arith.constant 9.99999971E-10 : f32
    %155 = vector.broadcast %cst_23 : f32 to vector<8x128xf32>
    %156 = arith.maximumf %135, %155 : vector<8x128xf32>
    %157 = tpu.reciprocal %156 {approx = true} : vector<8x128xf32> -> vector<8x128xf32>
    %158 = arith.mulf %131, %157 : vector<8x128xf32>
    %159 = arith.subf %154, %135 : vector<8x128xf32>
    %cst_24 = arith.constant 9.99999971E-10 : f32
    %160 = vector.broadcast %cst_24 : f32 to vector<8x128xf32>
    %161 = arith.maximumf %154, %160 : vector<8x128xf32>
    %162 = tpu.reciprocal %161 {approx = true} : vector<8x128xf32> -> vector<8x128xf32>
    %163 = arith.mulf %159, %162 : vector<8x128xf32>
    %164 = arith.subf %163, %158 : vector<8x128xf32>
    %165 = vector.extract_strided_slice %34 {offsets = [4, 0], sizes = [1, 128], strides = [1, 1]} : vector<8x128xf32> to vector<1x128xf32>
    %166 = vector.extract_strided_slice %34 {offsets = [5, 0], sizes = [1, 128], strides = [1, 1]} : vector<8x128xf32> to vector<1x128xf32>
    %167 = vector.extract_strided_slice %34 {offsets = [6, 0], sizes = [1, 128], strides = [1, 1]} : vector<8x128xf32> to vector<1x128xf32>
    %168 = vector.extract_strided_slice %34 {offsets = [7, 0], sizes = [1, 128], strides = [1, 1]} : vector<8x128xf32> to vector<1x128xf32>
    %cst_25 = arith.constant 5.000000e-01 : f32
    %169 = vector.broadcast %cst_25 : f32 to vector<1x128xf32>
    %170 = arith.mulf %169, %167 : vector<1x128xf32>
    %cst_26 = arith.constant 5.000000e-01 : f32
    %171 = vector.broadcast %cst_26 : f32 to vector<1x128xf32>
    %172 = arith.mulf %171, %168 : vector<1x128xf32>
    %173 = arith.subf %165, %170 : vector<1x128xf32>
    %174 = arith.addf %165, %170 : vector<1x128xf32>
    %175 = arith.subf %166, %172 : vector<1x128xf32>
    %176 = arith.addf %166, %172 : vector<1x128xf32>
    %177 = arith.subf %174, %173 : vector<1x128xf32>
    %178 = arith.subf %176, %175 : vector<1x128xf32>
    %179 = arith.mulf %177, %178 : vector<1x128xf32>
    %180 = vector.extract_strided_slice %25 {offsets = [0, 13], sizes = [8, 1], strides = [1, 1]} : vector<8x21xf32> to vector<8x1xf32>
    %181 = vector.extract_strided_slice %25 {offsets = [0, 14], sizes = [8, 1], strides = [1, 1]} : vector<8x21xf32> to vector<8x1xf32>
    %182 = vector.extract_strided_slice %25 {offsets = [0, 15], sizes = [8, 1], strides = [1, 1]} : vector<8x21xf32> to vector<8x1xf32>
    %183 = vector.extract_strided_slice %25 {offsets = [0, 16], sizes = [8, 1], strides = [1, 1]} : vector<8x21xf32> to vector<8x1xf32>
    %184 = vector.extract_strided_slice %25 {offsets = [0, 17], sizes = [8, 1], strides = [1, 1]} : vector<8x21xf32> to vector<8x1xf32>
    %185 = vector.broadcast %174 : vector<1x128xf32> to vector<8x128xf32>
    %186 = vector.broadcast %182 : vector<8x1xf32> to vector<8x128xf32>
    %187 = arith.minimumf %185, %186 : vector<8x128xf32>
    %188 = vector.broadcast %173 : vector<1x128xf32> to vector<8x128xf32>
    %189 = vector.broadcast %180 : vector<8x1xf32> to vector<8x128xf32>
    %190 = arith.maximumf %188, %189 : vector<8x128xf32>
    %191 = arith.subf %187, %190 : vector<8x128xf32>
    %cst_27 = arith.constant 0.000000e+00 : f32
    %192 = vector.broadcast %cst_27 : f32 to vector<8x128xf32>
    %193 = arith.maximumf %191, %192 : vector<8x128xf32>
    %194 = vector.broadcast %176 : vector<1x128xf32> to vector<8x128xf32>
    %195 = vector.broadcast %183 : vector<8x1xf32> to vector<8x128xf32>
    %196 = arith.minimumf %194, %195 : vector<8x128xf32>
    %197 = vector.broadcast %175 : vector<1x128xf32> to vector<8x128xf32>
    %198 = vector.broadcast %181 : vector<8x1xf32> to vector<8x128xf32>
    %199 = arith.maximumf %197, %198 : vector<8x128xf32>
    %200 = arith.subf %196, %199 : vector<8x128xf32>
    %cst_28 = arith.constant 0.000000e+00 : f32
    %201 = vector.broadcast %cst_28 : f32 to vector<8x128xf32>
    %202 = arith.maximumf %200, %201 : vector<8x128xf32>
    %203 = arith.mulf %193, %202 : vector<8x128xf32>
    %204 = vector.broadcast %179 : vector<1x128xf32> to vector<8x128xf32>
    %205 = vector.broadcast %184 : vector<8x1xf32> to vector<8x128xf32>
    %206 = arith.addf %204, %205 : vector<8x128xf32>
    %207 = arith.subf %206, %203 : vector<8x128xf32>
    %208 = vector.broadcast %174 : vector<1x128xf32> to vector<8x128xf32>
    %209 = vector.broadcast %182 : vector<8x1xf32> to vector<8x128xf32>
    %210 = arith.maximumf %208, %209 : vector<8x128xf32>
    %211 = vector.broadcast %173 : vector<1x128xf32> to vector<8x128xf32>
    %212 = vector.broadcast %180 : vector<8x1xf32> to vector<8x128xf32>
    %213 = arith.minimumf %211, %212 : vector<8x128xf32>
    %214 = arith.subf %210, %213 : vector<8x128xf32>
    %cst_29 = arith.constant 0.000000e+00 : f32
    %215 = vector.broadcast %cst_29 : f32 to vector<8x128xf32>
    %216 = arith.maximumf %214, %215 : vector<8x128xf32>
    %217 = vector.broadcast %176 : vector<1x128xf32> to vector<8x128xf32>
    %218 = vector.broadcast %183 : vector<8x1xf32> to vector<8x128xf32>
    %219 = arith.maximumf %217, %218 : vector<8x128xf32>
    %220 = vector.broadcast %175 : vector<1x128xf32> to vector<8x128xf32>
    %221 = vector.broadcast %181 : vector<8x1xf32> to vector<8x128xf32>
    %222 = arith.minimumf %220, %221 : vector<8x128xf32>
    %223 = arith.subf %219, %222 : vector<8x128xf32>
    %cst_30 = arith.constant 0.000000e+00 : f32
    %224 = vector.broadcast %cst_30 : f32 to vector<8x128xf32>
    %225 = arith.maximumf %223, %224 : vector<8x128xf32>
    %226 = arith.mulf %216, %225 : vector<8x128xf32>
    %cst_31 = arith.constant 9.99999971E-10 : f32
    %227 = vector.broadcast %cst_31 : f32 to vector<8x128xf32>
    %228 = arith.maximumf %207, %227 : vector<8x128xf32>
    %229 = tpu.reciprocal %228 {approx = true} : vector<8x128xf32> -> vector<8x128xf32>
    %230 = arith.mulf %203, %229 : vector<8x128xf32>
    %231 = arith.subf %226, %207 : vector<8x128xf32>
    %cst_32 = arith.constant 9.99999971E-10 : f32
    %232 = vector.broadcast %cst_32 : f32 to vector<8x128xf32>
    %233 = arith.maximumf %226, %232 : vector<8x128xf32>
    %234 = tpu.reciprocal %233 {approx = true} : vector<8x128xf32> -> vector<8x128xf32>
    %235 = arith.mulf %231, %234 : vector<8x128xf32>
    %236 = arith.subf %235, %230 : vector<8x128xf32>
    %cst_33 = arith.constant 1.000000e+00 : f32
    %237 = vector.broadcast %cst_33 : f32 to vector<8x1xf32>
    %238 = arith.subf %237, %35 : vector<8x1xf32>
    %239 = vector.broadcast %238 : vector<8x1xf32> to vector<8x128xf32>
    %240 = arith.mulf %164, %239 : vector<8x128xf32>
    %241 = arith.addf %236, %240 : vector<8x128xf32>
    %242 = arith.maximumf %164, %241 : vector<8x128xf32>
    %cst_34 = arith.constant 1.000000e+00 : f32
    %243 = vector.broadcast %cst_34 : f32 to vector<8x128xf32>
    %244 = arith.mulf %243, %92 : vector<8x128xf32>
    %245 = arith.addf %33, %244 : vector<8x128xf32>
    %cst_35 = arith.constant 1.000000e+00 : f32
    %246 = vector.broadcast %cst_35 : f32 to vector<8x128xf32>
    %247 = arith.mulf %246, %242 : vector<8x128xf32>
    %248 = arith.addf %245, %247 : vector<8x128xf32>
    %c0_36 = arith.constant 0 : index
    %c0_37 = arith.constant 0 : index
    %249 = vector.load %arg7[%c0_36, %c0_37] : memref<8x128xf32, #tpu.memory_space<vmem>>, vector<8x128xf32>
    tpu.vector_store %arg7[%c0_36, %c0_37], %248 {strides = array<i32>} : memref<8x128xf32, #tpu.memory_space<vmem>>, vector<8x128xf32>,
    return
  }
  func.func @transform_0(%arg0: i32) -> (i32, i32) {
    %c0_i32 = arith.constant 0 : i32
    %c0_i32_0 = arith.constant 0 : i32
    return %c0_i32, %arg0 : i32, i32
  }
  func.func @transform_1(%arg0: i32) -> (i32, i32) {
    %c0_i32 = arith.constant 0 : i32
    %c0_i32_0 = arith.constant 0 : i32
    return %c0_i32, %arg0 : i32, i32
  }
  func.func @transform_2(%arg0: i32) -> (i32, i32) {
    %c0_i32 = arith.constant 0 : i32
    %c0_i32_0 = arith.constant 0 : i32
    return %c0_i32, %arg0 : i32, i32
  }
  func.func @transform_3(%arg0: i32) -> (i32, i32) {
    %c0_i32 = arith.constant 0 : i32
    %c0_i32_0 = arith.constant 0 : i32
    %c0_i32_1 = arith.constant 0 : i32
    return %c0_i32, %c0_i32_0 : i32, i32
  }
  func.func @transform_4(%arg0: i32) -> (i32, i32) {
    %c0_i32 = arith.constant 0 : i32
    %c0_i32_0 = arith.constant 0 : i32
    %c0_i32_1 = arith.constant 0 : i32
    return %c0_i32, %c0_i32_0 : i32, i32
  }
  func.func @transform_5(%arg0: i32) -> (i32, i32) {
    %c0_i32 = arith.constant 0 : i32
    %c0_i32_0 = arith.constant 0 : i32
    %c0_i32_1 = arith.constant 0 : i32
    return %c0_i32, %c0_i32_0 : i32, i32
  }
  func.func @transform_6(%arg0: i32) -> (i32, i32) {
    %c0_i32 = arith.constant 0 : i32
    %c0_i32_0 = arith.constant 0 : i32
    return %c0_i32, %arg0 : i32, i32
  }
}

</mosaic_0001>

<bundles_post_ra>
// kernel: tpu_custom_call.1
= control target key start
LH: loop header
LB: loop body
LE: loop exit
PB: predicated region body
PF: predicated region fallthrough
CT: control target
= control target key end

     0   :  { %11 = vsyncpa [#allocation3], 0  ;;  %s1568_s0 = inlined_call_operand.hbm [shape: f32[128,128], index: 0, kind: input, shape index: {}]   ;;  %s1569_s1 = inlined_call_operand.hbm [shape: f32[128,128], index: 1, kind: input, shape index: {}]   ;;  %s1570_s2 = inlined_call_operand.hbm [shape: f32[8,128], index: 2, kind: input, shape index: {}]   ;;  %s1571_s3 = inlined_call_operand.hbm [shape: f32[8,128], index: 3, kind: input, shape index: {}]   ;;  %s1572_s4 = inlined_call_operand.hbm [shape: f32[8,128], index: 4, kind: input, shape index: {}]   ;;  %s1573_s5 = inlined_call_operand.vmem [shape: f32[8,21], index: 5, kind: input, shape index: {}]   ;;  %s1574_s6 = inlined_call_operand.hbm [shape: f32[8,128], index: 6, kind: output, shape index: {}]  }
   0x1   :  { %12 = vsyncpa [#allocation6], 0 }
   0x2   :  { %13 = vsyncpa [#allocation9], 0 }
   0x3   :  { %14 = vsyncpa [#allocation4], 0  ;;  %s1174_s21 = smov [#allocation5]   ;;  %s1175_s23 = smov [#allocation8]  }
   0x4   :  { %s32_s22 = sshll.u32 %s1174_s21, 4  ;;  %s55_s24 = sshll.u32 %s1175_s23, 4  ;;  %s33_s22 = int_to_ptr.vmem [resolvable:$true] %s32_s22  ;;  %s56_s24 = int_to_ptr.vmem [resolvable:$true] %s55_s24 }
   0x5   :  { %s1054_s25 = scalar_lea.vmem %s33_s22, 2048  ;;  %p1059_p1 = scmp.lt.s32.totalorder %s33_s22, %s33_s22 }
   0x6   :  { %p1055_p0 = scmp.ne.s32.totalorder %s33_s22, %s1054_s25  ;;  %p1060_p2 = scmp.lt.s32.totalorder %s1054_s25, %s1054_s25 }
   0x8   :  { %p1061_p3 = por %p1060_p2, %p1059_p1 }
   0xa   :  { %p1062_p4 = pnand %p1061_p3, %p1055_p0 }
   0xc   :  { %1065 = shalt.err (!%p1062_p4)
}
   0xd   :  { %s1176_s26 = smov 128   ;;  %s1177_s27 = smov 8  }
   0xe   :  { %38 = dma.hbm_to_vmem [thread:$0]  %s1569_s1, 2048, %s33_s22, [#allocation6], %s1176_s26, %s1176_s26, %s1177_s27  }
   0xf   :  { %s1074_s30 = scalar_lea.vmem %s56_s24, 128  ;;  %p1079_p6 = scmp.lt.s32.totalorder %s56_s24, %s56_s24 }
  0x10   :  { %p1075_p5 = scmp.ne.s32.totalorder %s56_s24, %s1074_s30  ;;  %p1080_p7 = scmp.lt.s32.totalorder %s1074_s30, %s1074_s30 }
  0x12   :  { %p1081_p8 = por %p1080_p7, %p1079_p6 }
  0x14   :  { %p1082_p9 = pnand %p1081_p8, %p1075_p5 }
  0x16   :  { %1085 = shalt.err (!%p1082_p9)
}
  0x17   :  { %58 = dma.hbm_to_vmem [thread:$0]  %s1571_s3, 128, %s56_s24, [#allocation9]  }
  0x18   :  { %s1178_s9 = smov [#allocation2]   ;;  %s1179_s11 = smov [#allocation7]  }
  0x19   :  { %s20_s10 = sshll.u32 %s1178_s9, 4  ;;  %s45_s12 = sshll.u32 %s1179_s11, 4  ;;  %s21_s10 = int_to_ptr.vmem [resolvable:$true] %s20_s10  ;;  %s46_s12 = int_to_ptr.vmem [resolvable:$true] %s45_s12 }
  0x1a   :  { %s1094_s13 = scalar_lea.vmem %s21_s10, 2048  ;;  %p1099_p11 = scmp.lt.s32.totalorder %s21_s10, %s21_s10 }
  0x1b   :  { %p1095_p10 = scmp.ne.s32.totalorder %s21_s10, %s1094_s13  ;;  %p1100_p12 = scmp.lt.s32.totalorder %s1094_s13, %s1094_s13 }
  0x1d   :  { %p1101_p13 = por %p1100_p12, %p1099_p11 }
  0x1f   :  { %p1102_p0 = pnand %p1101_p13, %p1095_p10 }
  0x21   :  { %1105 = shalt.err (!%p1102_p0)
}
  0x22   :  { %26 = dma.hbm_to_vmem [thread:$0]  %s1568_s0, 2048, %s21_s10, [#allocation3], %s1176_s26, %s1176_s26, %s1177_s27  }
  0x23   :  { %s1114_s15 = scalar_lea.vmem %s46_s12, 128  ;;  %p1119_p2 = scmp.lt.s32.totalorder %s46_s12, %s46_s12 }
  0x24   :  { %p1115_p1 = scmp.ne.s32.totalorder %s46_s12, %s1114_s15  ;;  %p1120_p3 = scmp.lt.s32.totalorder %s1114_s15, %s1114_s15 }
  0x26   :  { %p1121_p4 = por %p1120_p3, %p1119_p2 }
  0x28   :  { %p1122_p5 = pnand %p1121_p4, %p1115_p1 }
  0x2a   :  { %1125 = shalt.err (!%p1122_p5)
}
  0x2b   :  { %48 = dma.hbm_to_vmem [thread:$0]  %s1570_s2, 128, %s46_s12, [#allocation6]  }
  0x2c   :  { %s1180_s17 = smov [#allocation10]  }
  0x2d   :  { %s65_s18 = sshll.u32 %s1180_s17, 4  ;;  %s66_s18 = int_to_ptr.vmem [resolvable:$true] %s65_s18 }
  0x2e   :  { %s1134_s19 = scalar_lea.vmem %s66_s18, 128  ;;  %p1139_p7 = scmp.lt.s32.totalorder %s66_s18, %s66_s18 }
  0x2f   :  { %p1135_p6 = scmp.ne.s32.totalorder %s66_s18, %s1134_s19  ;;  %p1140_p8 = scmp.lt.s32.totalorder %s1134_s19, %s1134_s19 }
  0x31   :  { %p1141_p9 = por %p1140_p8, %p1139_p7 }
  0x33   :  { %p1142_p10 = pnand %p1141_p9, %p1135_p6 }
  0x35   :  { %1145 = shalt.err (!%p1142_p10)
}
  0x36   :  { %68 = dma.hbm_to_vmem [thread:$0]  %s1572_s4, 128, %s66_s18, [#allocation9]  }
  0x37   :  { %1166 = dma.done.wait [#allocation3], 2048  }
  0x38   :  { %1167 = vsyncadd [#allocation3], 4294965248 }
  0x39   :  { %1168 = dma.done.wait [#allocation6], 2176  }
  0x3a   :  { %1169 = vsyncadd [#allocation6], 4294965120 }
  0x3b   :  { %1170 = dma.done.wait [#allocation9], 256  }
  0x3c   :  { %1171 = vsyncadd [#allocation9], 4294967040  ;;  %v1181_v0 = vmov 11   ;;  %v1182_v1 = vmov 0.0   ;;  %v1183_v2 = vmov 10   ;;  %v1260_v3 = vld [vmem:[%s1573_s5] sm:$0xff] }
  0x3d   :  { %920 = vset.pattern.permute.xlu1 %v1181_v0  ;;  %817 = vmatprep.subr.mxu0 %v1182_v1  ;;  %v225_v4 = vld [vmem:[#allocation5 + $0x78] sm:$0xff]  ;;  %v224_v5 = vld [vmem:[#allocation5 + $0x70] sm:$0xff]  ;;  %v1263_v8 = vld [vmem:[#allocation2] sm:$0xff]  ;;  %v1184_v23 = vmov 9   ;;  %v1185_v28 = vmov 8   ;;  %vm1186_vm0 = vmmov 0  }
  0x3e   :  { %852 = vmatprep.subr.mxu1 %v1182_v1  ;;  %918 = vset.pattern.permute.xlu0 %v1183_v2  ;;  %v782_v6 = vmul.f32 -1.442695, %v225_v4  ;;  %v781_v7 = vmul.f32 -1.442695, %v224_v5  ;;  %v1265_v9 = vld [vmem:[#allocation2 + $0x8] sm:$0xff]  ;;  %v1268_v10 = vld [vmem:[#allocation2 + $0x10] sm:$0xff] }
  0x3f   :  { %627 = vperm.xlu1 %920, %v1260_v3   ;;  %607 = vperm.xlu0 %918, %v1260_v3   ;;  %v1270_v11 = vld [vmem:[#allocation2 + $0x18] sm:$0xff]  ;;  %v1272_v12 = vld [vmem:[#allocation2 + $0x20] sm:$0xff]  ;;  %v1274_v13 = vld [vmem:[#allocation2 + $0x28] sm:$0xff]  ;;  %v1187_v44 = vmov 15   ;;  %v1188_v48 = vmov 13   ;;  %v1189_v55 = vmov 16  }
  0x40   :  { %940 = vpow2.f32 %v782_v6  ;;  %v1276_v14 = vld [vmem:[#allocation2 + $0x30] sm:$0xff]  ;;  %v1278_v15 = vld [vmem:[#allocation2 + $0x38] sm:$0xff]  ;;  %v102_v16 = vmax.f32 %v1263_v8, %v1272_v12  ;;  %v1282_v17 = vld [vmem:[#allocation2 + $0x40] sm:$0xff]  ;;  %v103_v20 = vmax.f32 %v1265_v9, %v1274_v13  ;;  %849 = vmatprep.mubr.msk.f32.mxu0 %vm1186_vm0, %v1182_v1  ;;  %884 = vmatprep.mubr.msk.f32.mxu1 %vm1186_vm0, %v1182_v1  ;;  %v1190_v57 = vmov 12   ;;  %s1204_s4 = smov [#allocation11]  }
  0x41   :  { %942 = vpow2.f32 %v781_v7  ;;  %v1284_v18 = vld [vmem:[#allocation2 + $0x48] sm:$0xff]  ;;  %v1286_v19 = vld [vmem:[#allocation2 + $0x50] sm:$0xff]  ;;  %v104_v21 = vmax.f32 %v1268_v10, %v1276_v14  ;;  %v105_v22 = vmax.f32 %v1270_v11, %v1278_v15  ;;  %v1294_v24 = vld [vmem:[#allocation2 + $0x58] sm:$0xff]  ;;  %v1191_v7 = vmov 14   ;;  %s756_s5 = sshll.u32 %s1204_s4, 4  ;;  %s757_s5 = int_to_ptr.vmem [resolvable:$true] %s756_s5 }
  0x42   :  { %v1296_v25 = vld [vmem:[#allocation2 + $0x60] sm:$0xff]  ;;  %v1298_v26 = vld [vmem:[#allocation2 + $0x68] sm:$0xff]  ;;  %v106_v27 = vmax.f32 %v102_v16, %v1282_v17  ;;  %v1302_v29 = vld [vmem:[#allocation2 + $0x70] sm:$0xff]  ;;  %v107_v31 = vmax.f32 %v103_v20, %v1284_v18  ;;  %s1146_s22 = scalar_lea.vmem %s757_s5, 128  ;;  %p1151_p12 = scmp.lt.s32.totalorder %s757_s5, %s757_s5 }
  0x43   :  { %921 = vset.pattern.permute.xlu1 %v1184_v23  ;;  %919 = vset.pattern.permute.xlu0 %v1185_v28  ;;  %v1304_v30 = vld [vmem:[#allocation2 + $0x78] sm:$0xff]  ;;  %v108_v32 = vmax.f32 %v104_v21, %v1286_v19  ;;  %v109_v33 = vmax.f32 %v105_v22, %v1294_v24  ;;  %v223_v34 = vld [vmem:[#allocation5 + $0x68] sm:$0xff]  ;;  %v222_v37 = vld [vmem:[#allocation5 + $0x60] sm:$0xff]  ;;  %v1192_v22 = vmov 5   ;;  %p1147_p11 = scmp.ne.s32.totalorder %s757_s5, %s1146_s22  ;;  %p1152_p13 = scmp.lt.s32.totalorder %s1146_s22, %s1146_s22 }
  0x44   :  { %636 = vperm.xlu1 %921, %v1260_v3   ;;  %616 = vperm.xlu0 %919, %v1260_v3   ;;  %v110_v35 = vmax.f32 %v106_v27, %v1296_v25  ;;  %v780_v36 = vmul.f32 -1.442695, %v223_v34  ;;  %v221_v38 = vld [vmem:[#allocation5 + $0x58] sm:$0xff]  ;;  %v111_v39 = vmax.f32 %v107_v31, %v1298_v26  ;;  %v779_v42 = vmul.f32 -1.442695, %v222_v37  ;;  %v220_v47 = vld [vmem:[#allocation5 + $0x50] sm:$0xff] }
  0x45   :  { %v112_v40 = vmax.f32 %v108_v32, %v1302_v29  ;;  %v113_v41 = vmax.f32 %v109_v33, %v1304_v30  ;;  %v778_v43 = vmul.f32 -1.442695, %v221_v38  ;;  %v219_v49 = vld [vmem:[#allocation5 + $0x48] sm:$0xff]  ;;  %v777_v51 = vmul.f32 -1.442695, %v220_v47  ;;  %v218_v54 = vld [vmem:[#allocation5 + $0x40] sm:$0xff]  ;;  %p1153_p0 = por %p1152_p13, %p1151_p12 }
  0x46   :  { %944 = vpow2.f32 %v780_v36  ;;  %v114_v45 = vmax.f32 %v110_v35, %v111_v39  ;;  %v776_v53 = vmul.f32 -1.442695, %v219_v49  ;;  %v217_v56 = vld [vmem:[#allocation5 + $0x38] sm:$0xff]  ;;  %v216_v60 = vld [vmem:[#allocation5 + $0x30] sm:$0xff]  ;;  %v775_v63 = vmul.f32 -1.442695, %v218_v54 }
  0x47   :  { %v115_v46 = vmax.f32 %v112_v40, %v113_v41  ;;  %946 = vpow2.f32 %v779_v42  ;;  %v215_v0 = vld [vmem:[#allocation5 + $0x28] sm:$0xff]  ;;  %v774_v5 = vmul.f32 -1.442695, %v217_v56  ;;  %v773_v6 = vmul.f32 -1.442695, %v216_v60  ;;  %v214_v21 = vld [vmem:[#allocation5 + $0x20] sm:$0xff]  ;;  %p1154_p1 = pnand %p1153_p0, %p1147_p11 }
  0x48   :  { %922 = vset.pattern.permute.xlu1 %v1187_v44  ;;  %923 = vset.pattern.permute.xlu0 %v1188_v48  ;;  %948 = vpow2.f32 %v778_v43  ;;  %v772_v20 = vmul.f32 -1.442695, %v215_v0  ;;  %v213_v23 = vld [vmem:[#allocation5 + $0x18] sm:$0xff]  ;;  %v212_v31 = vld [vmem:[#allocation5 + $0x10] sm:$0xff]  ;;  %v771_v34 = vmul.f32 -1.442695, %v214_v21 }
  0x49   :  { %675 = vperm.xlu1 %922, %v1260_v3   ;;  %684 = vperm.xlu0 %923, %v1260_v3   ;;  %v116_v50 = vmax.f32 %v114_v45, %v115_v46  ;;  %950 = vpow2.f32 %v777_v51  ;;  %v770_v37 = vmul.f32 -1.442695, %v213_v23  ;;  %v1193_v38 = vmov 17   ;;  %v211_v47 = vld [vmem:[#allocation5 + $0x8] sm:$0xff] }
  0x4a   :  { %952 = vpow2.f32 %v776_v53  ;;  %v769_v39 = vmul.f32 -1.442695, %v212_v31  ;;  %v1194_v40 = vmov 6   ;;  %v1196_v53 = vmov 3  }
  0x4b   :  { %v117_v52 = vrot.slane %v116_v50, 4  ;;  %v768_v56 = vmul.f32 -1.442695, %v211_v47  ;;  %v1199_v23 = vmov 1  }
  0x4d   :  { %924 = vset.pattern.permute.xlu1 %v1189_v55  ;;  %926 = vset.pattern.permute.xlu0 %v1190_v57  ;;  %v941_v58 = vpop.eup %940  ;;  %v118_v59 = vmax.f32 %v116_v50, %v117_v52  ;;  %v1195_v50 = vmov 4  }
  0x4e   :  { %695 = vperm.xlu1 %924, %v1260_v3   ;;  %648 = vperm.xlu0 %926, %v1260_v3   ;;  %v943_v61 = vpop.eup %942  ;;  %v289_v62 = vadd.f32 1.0, %v941_v58 }
  0x4f   :  { %v288_v2 = vadd.f32 1.0, %v943_v61  ;;  %v119_v4 = vrot.slane %v118_v59, 2 }
  0x50   :  { %954 = vrcp.f32 %v289_v62 }
  0x51   :  { %956 = vrcp.f32 %v288_v2  ;;  %v120_v16 = vmax.f32 %v118_v59, %v119_v4 }
  0x52   :  { %925 = vset.pattern.permute.xlu1 %v1191_v7  ;;  %929 = vset.pattern.permute.xlu0 %v1192_v22  ;;  %958 = vpow2.f32 %v775_v63  ;;  %v1197_v63 = vmov 0  }
  0x53   :  { %704 = vperm.xlu1 %925, %v1260_v3   ;;  %557 = vperm.xlu0 %929, %v1260_v3   ;;  %v945_v27 = vpop.eup %944  ;;  %v121_v28 = vrot.slane %v120_v16, 1  ;;  %960 = vpow2.f32 %v774_v5 }
  0x54   :  { %v947_v32 = vpop.eup %946  ;;  %v287_v33 = vadd.f32 1.0, %v945_v27  ;;  %962 = vpow2.f32 %v773_v6  ;;  %v1198_v6 = vmov 18  }
  0x55   :  { %v949_v35 = vpop.eup %948  ;;  %v1322_v36 = vmax.f32 %v120_v16, %v121_v28  ;;  %964 = vpow2.f32 %v772_v20  ;;  %v286_v44 = vadd.f32 1.0, %v947_v32 }
  0x56   :  { %966 = vrcp.f32 %v287_v33  ;;  %v285_v46 = vadd.f32 1.0, %v949_v35 }
  0x57   :  { %927 = vset.pattern.permute.xlu1 %v1193_v38  ;;  %932 = vset.pattern.permute.xlu0 %v1194_v40  ;;  %v123_v41 = vsub.f32 %v1263_v8, %v1322_v36  ;;  %v124_v42 = vsub.f32 %v1265_v9, %v1322_v36  ;;  %v125_v43 = vsub.f32 %v1268_v10, %v1322_v36  ;;  %968 = vpow2.f32 %v771_v34  ;;  %v1336_v9 = vpop.eup %950 }
  0x58   :  { %716 = vperm.xlu1 %927, %v1260_v3   ;;  %v126_v45 = vsub.f32 %v1270_v11, %v1322_v36  ;;  %568 = vperm.xlu0 %932, %v1260_v3   ;;  %970 = vpow2.f32 %v770_v37  ;;  %v127_v8 = vsub.f32 %v1272_v12, %v1322_v36  ;;  %v1338_v51 = vpop.eup %952  ;;  %v128_v11 = vsub.f32 %v1274_v13, %v1322_v36  ;;  %v210_v12 = vld [vmem:[#allocation5] sm:$0xff] }
  0x59   :  { %972 = vpow2.f32 %v769_v39  ;;  %v139_v48 = vmul.f32 1.442695, %v123_v41  ;;  %v141_v10 = vmul.f32 1.442695, %v124_v42  ;;  %v143_v49 = vmul.f32 1.442695, %v125_v43 }
  0x5a   :  { %974 = vrcp.f32 %v286_v44  ;;  %v145_v52 = vmul.f32 1.442695, %v126_v45  ;;  %v129_v55 = vsub.f32 %v1276_v14, %v1322_v36  ;;  %v130_v13 = vsub.f32 %v1278_v15, %v1322_v36 }
  0x5b   :  { %976 = vrcp.f32 %v285_v46  ;;  %v147_v58 = vmul.f32 1.442695, %v127_v8  ;;  %v131_v14 = vsub.f32 %v1282_v17, %v1322_v36  ;;  %v767_v60 = vmul.f32 -1.442695, %v210_v12 }
  0x5c   :  { %928 = vset.pattern.permute.xlu1 %v1195_v50  ;;  %935 = vset.pattern.permute.xlu0 %v1196_v53  ;;  %978 = vpow2.f32 %v139_v48  ;;  %v132_v62 = vsub.f32 %v1284_v18, %v1322_v36  ;;  %v149_v15 = vmul.f32 1.442695, %v128_v11  ;;  %v133_v2 = vsub.f32 %v1286_v19, %v1322_v36 }
  0x5d   :  { %547 = vperm.xlu1 %928, %v1260_v3   ;;  %v1343_v54 = vpop.eup %954  ;;  %536 = vperm.xlu0 %935, %v1260_v3   ;;  %980 = vpow2.f32 %v141_v10  ;;  %v151_v4 = vmul.f32 1.442695, %v129_v55  ;;  %v134_v18 = vsub.f32 %v1294_v24, %v1322_v36  ;;  %v153_v5 = vmul.f32 1.442695, %v130_v13 }
  0x5e   :  { %v1348_v57 = vpop.eup %956  ;;  %818 = vmatpush3.msra.mxu0 %v1343_v54  ;;  %982 = vpow2.f32 %v143_v49  ;;  %v135_v19 = vsub.f32 %v1296_v25, %v1322_v36  ;;  %v155_v16 = vmul.f32 1.442695, %v131_v14  ;;  %v136_v20 = vsub.f32 %v1298_v26, %v1322_v36 }
  0x5f   :  { %v1353_v59 = vpop.eup %958  ;;  %819 = vmatprep.subr.mxu0 %v1182_v1  ;;  %984 = vpow2.f32 %v145_v52  ;;  %v157_v21 = vmul.f32 1.442695, %v132_v62  ;;  %v159_v22 = vmul.f32 1.442695, %v133_v2  ;;  %v161_v25 = vmul.f32 1.442695, %v134_v18 }
  0x60   :  { %v1358_v61 = vpop.eup %960  ;;  %820 = vmatpush3.msra.mxu0 %v1348_v57  ;;  %986 = vpow2.f32 %v768_v56  ;;  %v163_v31 = vmul.f32 1.442695, %v135_v19  ;;  %v137_v32 = vsub.f32 %v1302_v29, %v1322_v36  ;;  %v165_v33 = vmul.f32 1.442695, %v136_v20 }
  0x61   :  { %930 = vset.pattern.permute.xlu1 %v1197_v63  ;;  %v1363_v0 = vpop.eup %962  ;;  %821 = vmatprep.subr.mxu0 %v1182_v1  ;;  %988 = vpow2.f32 %v147_v58  ;;  %v284_v35 = vadd.f32 1.0, %v1336_v9  ;;  %v138_v38 = vsub.f32 %v1304_v30, %v1322_v36  ;;  %v283_v39 = vadd.f32 1.0, %v1338_v51 }
  0x62   :  { %504 = vperm.xlu1 %930, %v1260_v3   ;;  %v1369_v17 = vpop.eup %964  ;;  %938 = vset.pattern.permute.xlu0 %v1198_v6  ;;  %990 = vpow2.f32 %v767_v60  ;;  %v1200_v29 = vmov 2   ;;  %v282_v41 = vadd.f32 1.0, %v1353_v59  ;;  %v167_v30 = vmul.f32 1.442695, %v137_v32 }
  0x63   :  { %v1374_v7 = vpop.eup %966  ;;  %586 = vperm.xlu0 %938, %v1260_v3   ;;  %992 = vpow2.f32 %v149_v15  ;;  %v281_v44 = vadd.f32 1.0, %v1358_v61  ;;  %v169_v46 = vmul.f32 1.442695, %v138_v38  ;;  %v280_v9 = vadd.f32 1.0, %v1363_v0 }
  0x64   :  { %822 = vmatpush3.msra.mxu0 %v1374_v7  ;;  %v969_v24 = vpop.eup %968  ;;  %994 = vpow2.f32 %v151_v4  ;;  %v1201_v48 = vmov 7   ;;  %v279_v50 = vadd.f32 1.0, %v1369_v17  ;;  %v1202_v14 = vmov 20  }
  0x65   :  { %823 = vmatprep.subr.mxu0 %v1182_v1  ;;  %v971_v27 = vpop.eup %970  ;;  %996 = vpow2.f32 %v153_v5  ;;  %v278_v11 = vadd.f32 1.0, %v969_v24  ;;  %v1203_v17 = vmov 19  }
  0x66   :  { %931 = vset.pattern.permute.xlu1 %v1199_v23  ;;  %v973_v28 = vpop.eup %972  ;;  %998 = vpow2.f32 %v155_v16  ;;  %v277_v59 = vadd.f32 1.0, %v971_v27  ;;  %v738_v16 = vsub.f32 1.0, %v1260_v3 }
  0x67   :  { %514 = vperm.xlu1 %931, %v1260_v3   ;;  %v1384_v26 = vpop.eup %974  ;;  %1000 = vpow2.f32 %v157_v21  ;;  %v276_v61 = vadd.f32 1.0, %v973_v28 }
  0x68   :  { %v1388_v34 = vpop.eup %976  ;;  %1002 = vpow2.f32 %v159_v22  ;;  %824 = vmatpush3.msra.mxu0 %v1384_v26 }
  0x69   :  { %v1392_v37 = vpop.eup %978  ;;  %1004 = vpow2.f32 %v161_v25  ;;  %825 = vmatprep.subr.mxu0 %v1182_v1 }
  0x6a   :  { %v1398_v40 = vpop.eup %980  ;;  %1006 = vpow2.f32 %v163_v31  ;;  %826 = vmatpush3.msra.mxu0 %v1388_v34 }
  0x6b   :  { %933 = vset.pattern.permute.xlu1 %v1200_v29  ;;  %v1403_v42 = vpop.eup %982  ;;  %1008 = vpow2.f32 %v165_v33  ;;  %v171_v36 = vadd.f32 %v1398_v40, %v1392_v37  ;;  %827 = vmatprep.subr.mxu0 %v1182_v1 }
  0x6c   :  { %525 = vperm.xlu1 %933, %v1260_v3   ;;  %v1408_v43 = vpop.eup %984  ;;  %1010 = vrcp.f32 %v284_v35 }
  0x6d   :  { %v987_v45 = vpop.eup %986  ;;  %v172_v8 = vadd.f32 %v1403_v42, %v171_v36  ;;  %1012 = vrcp.f32 %v283_v39 }
  0x6e   :  { %v1412_v47 = vpop.eup %988  ;;  %1014 = vrcp.f32 %v282_v41  ;;  %v275_v53 = vadd.f32 1.0, %v987_v45 }
  0x6f   :  { %v991_v10 = vpop.eup %990  ;;  %1016 = vpow2.f32 %v167_v30  ;;  %v173_v49 = vadd.f32 %v1408_v43, %v172_v8 }
  0x70   :  { %934 = vset.pattern.permute.xlu1 %v1201_v48  ;;  %v1418_v51 = vpop.eup %992  ;;  %1018 = vrcp.f32 %v281_v44  ;;  %v274_v56 = vadd.f32 1.0, %v991_v10 }
  0x71   :  { %579 = vperm.xlu1 %934, %v1260_v3   ;;  %v1420_v52 = vpop.eup %994  ;;  %1020 = vpow2.f32 %v169_v46  ;;  %v174_v12 = vadd.f32 %v1412_v47, %v173_v49 }
  0x72   :  { %v1423_v55 = vpop.eup %996  ;;  %1022 = vrcp.f32 %v280_v9  ;;  %v344_v9 = vld [vmem:[#allocation10] sm:$0xff] }
  0x73   :  { %v1425_v13 = vpop.eup %998  ;;  %v175_v58 = vadd.f32 %v1418_v51, %v174_v12  ;;  %1024 = vrcp.f32 %v279_v50 }
  0x74   :  { %v1428_v60 = vpop.eup %1000  ;;  %1026 = vrcp.f32 %v278_v11 }
  0x75   :  { %936 = vset.pattern.permute.xlu1 %v1202_v14  ;;  %v1431_v62 = vpop.eup %1002  ;;  %v176_v15 = vadd.f32 %v1420_v52, %v175_v58  ;;  %1028 = vrcp.f32 %v275_v53 }
  0x76   :  { %488 = vperm.xlu1 %936, %v1260_v3   ;;  %v1434_v63 = vpop.eup %1004  ;;  %1030 = vrcp.f32 %v274_v56 }
  0x77   :  { %v1436_v0 = vpop.eup %1006  ;;  %v177_v2 = vadd.f32 %v1423_v55, %v176_v15  ;;  %1032 = vrcp.f32 %v277_v59 }
  0x78   :  { %v1439_v4 = vpop.eup %1008  ;;  %1034 = vrcp.f32 %v276_v61 }
  0x79   :  { %v1441_v18 = vpop.eup %1010  ;;  %v178_v5 = vadd.f32 %v1425_v13, %v177_v2 }
  0x7a   :  { %937 = vset.pattern.permute.xlu1 %v1203_v17  ;;  %v1013_v19 = vpop.eup %1012  ;;  %828 = vmatpush3.msra.mxu0 %v1441_v18 }
  0x7b   :  { %493 = vperm.xlu1 %937, %v1260_v3   ;;  %v1015_v20 = vpop.eup %1014  ;;  %v179_v21 = vadd.f32 %v1428_v60, %v178_v5  ;;  %829 = vmatprep.subr.mxu0 %v1182_v1 }
  0x7c   :  { %v1017_v24 = vpop.eup %1016  ;;  %830 = vmatpush3.msra.mxu0 %v1013_v19 }
  0x7d   :  { %v1019_v22 = vpop.eup %1018  ;;  %v180_v23 = vadd.f32 %v1431_v62, %v179_v21  ;;  %831 = vmatprep.subr.mxu0 %v1182_v1  ;;  %v499_v21 = vlaneseq }
  0x7e   :  { %v1021_v27 = vpop.eup %1020  ;;  %832 = vmatpush3.msra.mxu0 %v1015_v20 }
  0x7f   :  { %939 = vset.pattern.permute.xlu1 %v1198_v6  ;;  %v1023_v25 = vpop.eup %1022  ;;  %v181_v3 = vadd.f32 %v1434_v63, %v180_v23  ;;  %833 = vmatprep.subr.mxu0 %v1182_v1 }
  0x80   :  { %741 = vperm.xlu1 %939, %v738_v16   ;;  %v1025_v28 = vpop.eup %1024  ;;  %834 = vmatpush3.msra.mxu0 %v1019_v22 }
  0x81   :  { %v1027_v31 = vpop.eup %1026  ;;  %v182_v32 = vadd.f32 %v1436_v0, %v181_v3  ;;  %835 = vmatprep.subr.mxu0 %v1182_v1 }
  0x82   :  { %v1029_v33 = vpop.eup %1028  ;;  %836 = vmatpush3.msra.mxu0 %v1023_v25 }
  0x83   :  { %v1031_v35 = vpop.eup %1030  ;;  %v183_v6 = vadd.f32 %v1439_v4, %v182_v32  ;;  %837 = vmatprep.subr.mxu0 %v1182_v1 }
  0x84   :  { %v1033_v38 = vpop.eup %1032  ;;  %838 = vmatpush3.msra.mxu0 %v1025_v28  ;;  %v322_v39 = vadd.f32 %v1031_v35, %v1029_v33 }
  0x85   :  { %v1035_v29 = vpop.eup %1034  ;;  %v184_v41 = vadd.f32 %v1017_v24, %v183_v6  ;;  %839 = vmatprep.subr.mxu0 %v1182_v1 }
  0x86   :  { %840 = vmatpush3.msra.mxu0 %v1027_v31  ;;  %v323_v30 = vadd.f32 %v1035_v29, %v322_v39 }
  0x87   :  { %v185_v36 = vadd.f32 %v1021_v27, %v184_v41  ;;  %841 = vmatprep.subr.mxu0 %v1182_v1 }
  0x88   :  { %842 = vmatpush3.msra.mxu0 %v1033_v38  ;;  %v324_v44 = vadd.f32 %v1033_v38, %v323_v30 }
  0x89   :  { %v186_v45 = vrot.slane %v185_v36, 4  ;;  %843 = vmatprep.subr.mxu0 %v1182_v1 }
  0x8a   :  { %844 = vmatpush3.msra.mxu0 %v1035_v29  ;;  %v325_v46 = vadd.f32 %v1027_v31, %v324_v44 }
  0x8b   :  { %v187_v8 = vadd.f32 %v186_v45, %v185_v36  ;;  %845 = vmatprep.subr.mxu0 %v1182_v1 }
  0x8c   :  { %846 = vmatpush3.msra.mxu0 %v1029_v33  ;;  %v326_v48 = vadd.f32 %v1025_v28, %v325_v46 }
  0x8d   :  { %v188_v10 = vrot.slane %v187_v8, 2  ;;  %847 = vmatprep.subr.mxu0 %v1182_v1 }
  0x8e   :  { %848 = vmatpush3.msra.mxu0 %v1031_v35  ;;  %v327_v49 = vadd.f32 %v1023_v25, %v326_v48 }
  0x8f   :  { %v189_v50 = vadd.f32 %v188_v10, %v187_v8  ;;  %850 = vmatmul.mubr.f32.vlgmr.msra.gmra.mxu0 %v344_v9 }
  0x90   :  { %v328_v11 = vadd.f32 %v1019_v22, %v327_v49 }
  0x91   :  { %v190_v12 = vrot.slane %v189_v50, 1 }
  0x92   :  { %v329_v53 = vadd.f32 %v1015_v20, %v328_v11 }
  0x93   :  { %v191_v56 = vadd.f32 %v190_v12, %v189_v50 }
  0x94   :  { %v330_v58 = vadd.f32 %v1013_v19, %v329_v53 }
  0x95   :  { %1036 = vrcp.f32 %v191_v56 }
  0x96   :  { %v331_v59 = vadd.f32 %v1441_v18, %v330_v58 }
  0x98   :  { %v332_v14 = vadd.f32 %v1388_v34, %v331_v59 }
  0x9a   :  { %v333_v61 = vadd.f32 %v1384_v26, %v332_v14 }
  0x9c   :  { %v334_v15 = vadd.f32 %v1374_v7, %v333_v61 }
  0x9e   :  { %v1468_v2 = vadd.f32 %v1348_v57, %v334_v15 }
  0xa2   :  { %v1037_v17 = vpop.eup %1036 }
  0xa3   :  { %v209_v5 = vmul.f32 %v1037_v17, %v1021_v27  ;;  %v208_v16 = vmul.f32 %v1037_v17, %v1017_v24  ;;  %v207_v20 = vmul.f32 %v1037_v17, %v1439_v4  ;;  %v206_v18 = vmul.f32 %v1037_v17, %v1436_v0  ;;  %v343_v0 = vld [vmem:[#allocation8] sm:$0xff]  ;;  %v1499_v4 = vld [vmem:[#allocation7] sm:$0xff] }
  0xa4   :  { %v205_v26 = vmul.f32 %v1037_v17, %v1434_v63  ;;  %v204_v57 = vmul.f32 %v1037_v17, %v1431_v62  ;;  %v203_v7 = vmul.f32 %v1037_v17, %v1428_v60  ;;  %v202_v34 = vmul.f32 %v1037_v17, %v1425_v13 }
  0xa5   :  { %853 = vmatpush3.msra.mxu1 %v209_v5  ;;  %v201_v63 = vmul.f32 %v1037_v17, %v1423_v55  ;;  %v200_v62 = vmul.f32 %v1037_v17, %v1420_v52  ;;  %v199_v60 = vmul.f32 %v1037_v17, %v1418_v51  ;;  %v198_v13 = vmul.f32 %v1037_v17, %v1412_v47 }
  0xa6   :  { %854 = vmatprep.subr.mxu1 %v1182_v1  ;;  %v197_v55 = vmul.f32 %v1037_v17, %v1408_v43  ;;  %v196_v52 = vmul.f32 %v1037_v17, %v1403_v42  ;;  %v195_v51 = vmul.f32 %v1037_v17, %v1398_v40  ;;  %v194_v47 = vmul.f32 %v1037_v17, %v1392_v37 }
  0xa7   :  { %855 = vmatpush3.msra.mxu1 %v208_v16  ;;  %v591_v40 = vmul.f32 0.5, %v1499_v4  ;;  %v1504_v37 = vshrl.u32 %v499_v21, 7 }
  0xa8   :  { %856 = vmatprep.subr.mxu1 %v1182_v1 }
  0xa9   :  { %857 = vmatpush3.msra.mxu1 %v207_v20  ;;  %v593_v24 = vrot.slane %v591_v40, 2  ;;  %v1509_v25 = vsub.s32 1, %v1504_v37  ;;  %v1512_v28 = vsub.s32 0, %v1504_v37  ;;  %v1519_v39 = vsub.s32 4, %v1504_v37 }
  0xaa   :  { %858 = vmatprep.subr.mxu1 %v1182_v1  ;;  %v1522_v29 = vsub.s32 5, %v1504_v37 }
  0xab   :  { %859 = vmatpush3.msra.mxu1 %v206_v18  ;;  %v596_v23 = vadd.f32 %v593_v24, %v1499_v4  ;;  %v595_v27 = vsub.f32 %v1499_v4, %v593_v24 }
  0xac   :  { %860 = vmatprep.subr.mxu1 %v1182_v1 }
  0xad   :  { %861 = vmatpush3.msra.mxu1 %v205_v26  ;;  %v597_v31 = vsub.f32 %v596_v23, %v595_v27  ;;  %v625_v32 = vrot.slane %v596_v23, %v1509_v25  ;;  %v634_v33 = vrot.slane %v595_v27, %v1509_v25  ;;  %v605_v35 = vrot.slane %v596_v23, %v1512_v28 }
  0xae   :  { %862 = vmatprep.subr.mxu1 %v1182_v1  ;;  %v614_v6 = vrot.slane %v595_v27, %v1512_v28  ;;  %v673_v9 = vrot.slane %v596_v23, %v1519_v39  ;;  %v693_v48 = vrot.slane %v596_v23, %v1522_v29  ;;  %v702_v10 = vrot.slane %v595_v27, %v1522_v29 }
  0xaf   :  { %863 = vmatpush3.msra.mxu1 %v204_v57  ;;  %v599_v41 = vrot.slane %v597_v31, 1  ;;  %v682_v49 = vrot.slane %v595_v27, %v1519_v39 }
  0xb0   :  { %864 = vmatprep.subr.mxu1 %v1182_v1 }
  0xb1   :  { %865 = vmatpush3.msra.mxu1 %v203_v7  ;;  %v601_v11 = vmul.f32 %v599_v41, %v597_v31 }
  0xb2   :  { %866 = vmatprep.subr.mxu1 %v1182_v1 }
  0xb3   :  { %867 = vmatpush3.msra.mxu1 %v202_v34  ;;  %v646_v57 = vrot.slane %v601_v11, %v1512_v28 }
  0xb4   :  { %868 = vmatprep.subr.mxu1 %v1182_v1 }
  0xb5   :  { %869 = vmatpush3.msra.mxu1 %v201_v63 }
  0xb6   :  { %870 = vmatprep.subr.mxu1 %v1182_v1 }
  0xb7   :  { %871 = vmatpush3.msra.mxu1 %v200_v62 }
  0xb8   :  { %872 = vmatprep.subr.mxu1 %v1182_v1 }
  0xb9   :  { %873 = vmatpush3.msra.mxu1 %v199_v60 }
  0xba   :  { %874 = vmatprep.subr.mxu1 %v1182_v1  ;;  %v628_v43 = vpop.permute.xlu1 %627 }
  0xbb   :  { %875 = vmatpush3.msra.mxu1 %v198_v13  ;;  %v630_v44 = vmin.f32 %v625_v32, %v628_v43  ;;  %v657_v53 = vmax.f32 %v625_v32, %v628_v43 }
  0xbc   :  { %876 = vmatprep.subr.mxu1 %v1182_v1 }
  0xbd   :  { %877 = vmatpush3.msra.mxu1 %v197_v55 }
  0xbe   :  { %878 = vmatprep.subr.mxu1 %v1182_v1 }
  0xbf   :  { %879 = vmatpush3.msra.mxu1 %v196_v52  ;;  %v637_v42 = vpop.permute.xlu1 %636 }
  0xc0   :  { %880 = vmatprep.subr.mxu1 %v1182_v1  ;;  %v639_v45 = vmax.f32 %v634_v33, %v637_v42  ;;  %v658_v56 = vmin.f32 %v634_v33, %v637_v42 }
  0xc1   :  { %881 = vmatpush3.msra.mxu1 %v195_v51 }
  0xc2   :  { %882 = vmatprep.subr.mxu1 %v1182_v1  ;;  %v608_v1 = vpop.permute.xlu0 %607  ;;  %v640_v14 = vsub.f32 %v630_v44, %v639_v45  ;;  %v659_v18 = vsub.f32 %v657_v53, %v658_v56  ;;  %v336_v45 = vadd.f32 %v1343_v54, %v1468_v2  ;;  %v502_v56 = vrot.slane %v1499_v4, %v1512_v28 }
  0xc3   :  { %883 = vmatpush3.msra.mxu1 %v194_v47  ;;  %v610_v46 = vmin.f32 %v605_v35, %v608_v1  ;;  %v653_v58 = vmax.f32 %v605_v35, %v608_v1 }
  0xc4   :  { %885 = vmatmul.mubr.f32.vlgmr.msra.gmra.mxu1 %v343_v0  ;;  %v1501_v19 = vpop.permute.xlu1 %675  ;;  %v641_v60 = vmax.f32 %v640_v14, 0.0  ;;  %v714_v0 = vrot.slane %v601_v11, %v1519_v39  ;;  %v660_v43 = vmax.f32 %v659_v18, 0.0 }
  0xc5   :  { %v678_v17 = vmin.f32 %v673_v9, %v1501_v19  ;;  %v721_v7 = vmax.f32 %v673_v9, %v1501_v19 }
  0xc6   :  { %v617_v38 = vpop.permute.xlu0 %616 }
  0xc7   :  { %v619_v8 = vmax.f32 %v614_v6, %v617_v38  ;;  %v654_v59 = vmin.f32 %v614_v6, %v617_v38 }
  0xc9   :  { %v696_v22 = vpop.permute.xlu1 %695  ;;  %v620_v61 = vsub.f32 %v610_v46, %v619_v8  ;;  %v655_v26 = vsub.f32 %v653_v58, %v654_v59  ;;  %v512_v58 = vrot.slane %v1499_v4, %v1509_v25 }
  0xca   :  { %v685_v12 = vpop.permute.xlu0 %684  ;;  %v698_v5 = vmin.f32 %v693_v48, %v696_v22  ;;  %v725_v34 = vmax.f32 %v693_v48, %v696_v22 }
  0xcb   :  { %v687_v20 = vmax.f32 %v682_v49, %v685_v12  ;;  %v722_v62 = vmin.f32 %v682_v49, %v685_v12  ;;  %v621_v55 = vmax.f32 %v620_v61, 0.0  ;;  %v656_v40 = vmax.f32 %v655_v26, 0.0 }
  0xcc   :  { %v555_v49 = vrot.slane %v1499_v4, %v1522_v29  ;;  %v576_v29 = vsub.s32 7, %v1504_v37 }
  0xcd   :  { %v688_v52 = vsub.f32 %v678_v17, %v687_v20  ;;  %v723_v21 = vsub.f32 %v721_v7, %v722_v62  ;;  %v642_v27 = vmul.f32 %v641_v60, %v621_v55  ;;  %v661_v22 = vmul.f32 %v660_v43, %v656_v40 }
  0xce   :  { %v705_v3 = vpop.permute.xlu1 %704  ;;  %v649_v47 = vpop.permute.xlu0 %648  ;;  %v577_v28 = vrot.slane %v1499_v4, %v576_v29 }
  0xcf   :  { %v707_v16 = vmax.f32 %v702_v10, %v705_v3  ;;  %v726_v63 = vmin.f32 %v702_v10, %v705_v3  ;;  %v689_v23 = vmax.f32 %v688_v52, 0.0  ;;  %v651_v1 = vadd.f32 %v649_v47, %v646_v57 }
  0xd0   :  { %v724_v3 = vmax.f32 %v723_v21, 0.0  ;;  %v666_v6 = vmax.f32 %v661_v22, 1e-09  ;;  %v545_v10 = vrot.slane %v1499_v4, %v1519_v39  ;;  %v522_v39 = vsub.s32 2, %v1504_v37 }
  0xd1   :  { %v708_v13 = vsub.f32 %v698_v5, %v707_v16  ;;  %v727_v42 = vsub.f32 %v725_v34, %v726_v63  ;;  %v652_v35 = vsub.f32 %v651_v1, %v642_v27 }
  0xd2   :  { %1038 = vrcp.f32 %v666_v6  ;;  %v558_v48 = vpop.permute.xlu0 %557  ;;  %v523_v26 = vrot.slane %v1499_v4, %v522_v39 }
  0xd3   :  { %v717_v30 = vpop.permute.xlu1 %716  ;;  %v709_v24 = vmax.f32 %v708_v13, 0.0  ;;  %v728_v19 = vmax.f32 %v727_v42, 0.0  ;;  %v662_v44 = vmax.f32 %v652_v35, 1e-09  ;;  %v560_v12 = vsub.f32 %v555_v49, %v558_v48 }
  0xd4   :  { %v719_v32 = vadd.f32 %v717_v30, %v714_v0  ;;  %v337_v30 = vrot.slane %v336_v45, 4  ;;  %v665_v25 = vsub.f32 %v661_v22, %v652_v35 }
  0xd5   :  { %v1534_v33 = vmul.f32 %v709_v24, %v689_v23  ;;  %v1536_v38 = vmul.f32 %v728_v19, %v724_v3  ;;  %1040 = vrcp.f32 %v662_v44  ;;  %v561_v5 = vand.u32 2147483647, %v560_v12 }
  0xd6   :  { %v338_v54 = vadd.f32 %v337_v30, %v336_v45  ;;  %v569_v59 = vpop.permute.xlu0 %568 }
  0xd7   :  { %v1539_v41 = vsub.f32 %v719_v32, %v1534_v33  ;;  %v734_v8 = vmax.f32 %v1536_v38, 1e-09 }
  0xd8   :  { %v548_v15 = vpop.permute.xlu1 %547  ;;  %v339_v14 = vrot.slane %v338_v54, 2 }
  0xd9   :  { %v730_v9 = vmax.f32 %v1539_v41, 1e-09  ;;  %1042 = vrcp.f32 %v734_v8  ;;  %v550_v2 = vsub.f32 %v545_v10, %v548_v15  ;;  %v533_v15 = vsub.s32 3, %v1504_v37 }
  0xda   :  { %v340_v7 = vadd.f32 %v339_v14, %v338_v54  ;;  %v537_v0 = vpop.permute.xlu0 %536  ;;  %v733_v43 = vsub.f32 %v1536_v38, %v1539_v41 }
  0xdb   :  { %1044 = vrcp.f32 %v730_v9  ;;  %v551_v61 = vand.u32 2147483647, %v550_v2  ;;  %v534_v60 = vrot.slane %v1499_v4, %v533_v15 }
  0xdc   :  { %v341_v42 = vrot.slane %v340_v7, 1 }
  0xdd   :  { %v505_v51 = vpop.permute.xlu1 %504  ;;  %v562_v63 = vadd.f32 %v561_v5, %v551_v61  ;;  %v539_v23 = vsub.f32 %v534_v60, %v537_v0 }
  0xde   :  { %v507_v20 = vsub.f32 %v502_v56, %v505_v51  ;;  %v587_v8 = vpop.permute.xlu0 %586 }
  0xdf   :  { %v1039_v57 = vpop.eup %1038  ;;  %v540_v45 = vand.u32 2147483647, %v539_v23 }
  0xe0   :  { %v508_v13 = vand.u32 2147483647, %v507_v20  ;;  %v668_v21 = vmul.f32 %v1039_v57, %v665_v25 }
  0xe2   :  { %v515_v31 = vpop.permute.xlu1 %514  ;;  %v1041_v34 = vpop.eup %1040 }
  0xe3   :  { %v517_v18 = vsub.f32 %v512_v58, %v515_v31  ;;  %v664_v40 = vmul.f32 %v1041_v34, %v642_v27 }
  0xe5   :  { %v518_v55 = vand.u32 2147483647, %v517_v18  ;;  %v669_v31 = vsub.f32 %v668_v21, %v664_v40 }
  0xe6   :  { %v1043_v51 = vpop.eup %1042 }
  0xe7   :  { %v526_v46 = vpop.permute.xlu1 %525  ;;  %v519_v1 = vadd.f32 %v518_v55, %v508_v13  ;;  %v736_v35 = vmul.f32 %v1043_v51, %v733_v43 }
  0xe8   :  { %v528_v52 = vsub.f32 %v523_v26, %v526_v46  ;;  %v1045_v24 = vpop.eup %1044 }
  0xe9   :  { %v732_v32 = vmul.f32 %v1045_v24, %v1534_v33 }
  0xea   :  { %v529_v19 = vand.u32 2147483647, %v528_v52 }
  0xeb   :  { %v737_v41 = vsub.f32 %v736_v35, %v732_v32 }
  0xec   :  { %v580_v11 = vpop.permute.xlu1 %579  ;;  %v530_v44 = vadd.f32 %v529_v19, %v519_v1 }
  0xed   :  { %v582_v47 = vsub.f32 %v577_v28, %v580_v11 }
  0xee   :  { %v541_v9 = vadd.f32 %v540_v45, %v530_v44 }
  0xef   :  { %v583_v22 = vand.u32 2147483647, %v582_v47 }
  0xf1   :  { %v489_v17 = vpop.permute.xlu1 %488 }
 0x14f   :  { %v1524_v36 = vpop.f32.mrf.mxu0 }
 0x151   :  { %v851_v50 = vpop.f32.mrf.mxu0 }
 0x152   :  { %v565_v50 = vsub.s32 6, %v1504_v37  ;;  %v494_v37 = vpop.permute.xlu1 %493 }
 0x154   :  { %v566_v53 = vrot.slane %v1499_v4, %v565_v50  ;;  %v342_v4 = vadd.f32 %v341_v42, %v340_v7 }
 0x156   :  { %v571_v16 = vsub.f32 %v566_v53, %v569_v59  ;;  %v742_v6 = vpop.permute.xlu1 %741  ;;  %v491_v38 = vmul.f32 %v489_v17, %v342_v4 }
 0x157   :  { %v744_v27 = vmul.f32 %v742_v6, %v669_v31 }
 0x158   :  { %v572_v62 = vand.u32 2147483647, %v571_v16  ;;  %v496_v10 = vadd.f32 %v494_v37, %v491_v38 }
 0x159   :  { %v745_v49 = vadd.f32 %v744_v27, %v737_v41 }
 0x15a   :  { %v573_v3 = vadd.f32 %v572_v62, %v562_v63 }
 0x15b   :  { %v746_v33 = vmax.f32 %v669_v31, %v745_v49 }
 0x15c   :  { %v584_v46 = vadd.f32 %v583_v22, %v573_v3 }
 0x15e   :  { %v589_v30 = vmul.f32 %v587_v8, %v584_v46 }
 0x160   :  { %v590_v54 = vmax.f32 %v541_v9, %v589_v30 }
 0x184   :  { %v481_v48 = vpop.f32.mrf.mxu1 }
 0x185   :  { %v482_v50 = vadd.f32 %v481_v48, %v1524_v36 }
 0x186   :  { %v886_v11 = vpop.f32.mrf.mxu1 }
 0x187   :  { %v497_v2 = vadd.f32 %v496_v10, %v482_v50 }
 0x189   :  { %v747_v12 = vadd.f32 %v590_v54, %v497_v2 }
 0x18b   :  { %v748_v53 = vadd.f32 %v747_v12, %v746_v33 }
 0x18d   :  { %749 = vst [vmem:[#allocation11] sm:$0xff] %v748_v53 }
 0x18e   :  { %1157 = shalt.err (!%p1154_p1)
}
 0x18f   :  { %759 = dma.vmem_to_hbm [thread:$0]  %s757_s5, 128, %s1574_s6, [#allocation4]  }
 0x190   :  { %1172 = dma.done.wait [#allocation4], 128  }
 0x191   :  { %1173 = vsyncadd [#allocation4], 4294967168 }
 0x192   :  { %763 = vsyncpa [#allocation3], 1 }
 0x193   :  { %764 = vsyncpa [#allocation6], 1 }
 0x194   :  { %765 = vsyncpa [#allocation9], 1 }
 0x195   :  { %766 = vsyncpa [#allocation4], 1 }

</bundles_post_ra>
